<compile_context>
chip_gen: v7x
topology: tpu7x:2x2x1
jax: 0.10.0
libtpu: 0.0.40
codegen_flags: <defaults>
</compile_context>

<pallas_src>
import jax
import jax.numpy as jnp
import numpy as np
from jax.experimental import pallas as pl
from jax.experimental.pallas import tpu as pltpu

BITS = 4
PACK = 32 // BITS            # values per int32 word
MAXQ = (1 << BITS) - 1


def _round_up(v, m):
    return (v + m - 1) // m * m


def quantlinear_kernel(x_ref, qw_ref, z_ref, sc_ref, b_ref, o_ref, w_ref):
    """One (tm, tn) output tile, full-K reduction on the MXU.

    x_ref : (tm, K)          compute dtype (bf16)
    qw_ref: (K // PACK, tn)  int32   packed 4-bit weights (packed along K)
    z_ref : (G, tn)          f32     unpacked zero points for this N tile
    sc_ref: (G, tn)          f32     scales for this N tile
    b_ref : (1, tn)          f32     bias for this N tile
    o_ref : (tm, tn)         x dtype
    w_ref : (K, tn)          compute dtype scratch, dequantized weight tile
    """
    # Dequantize this N column's weight tile once; reuse it for every M tile.
    @pl.when(pl.program_id(1) == 0)
    def _dequantize():
        qw = qw_ref[...]                                   # (Kp, tn) int32
        kp, tn = qw.shape
        k = kp * PACK
        g = sc_ref.shape[0]
        gs = k // g                                        # group_size (multiple of PACK)
        # nibble s of word row kp holds infeature row kp*PACK + s
        # (mask after the arithmetic shift keeps the top nibble correct)
        parts = [jnp.bitwise_and(jnp.right_shift(qw, BITS * s), MAXQ) for s in range(PACK)]
        w_int = jnp.stack(parts, axis=1).reshape(g, gs, tn)
        z = z_ref[...]                                     # (G, tn) f32
        sc = sc_ref[...]                                   # (G, tn) f32
        w = (w_int.astype(jnp.float32) - z[:, None, :]) * sc[:, None, :]
        w_ref[...] = w.reshape(k, tn).astype(w_ref.dtype)

    acc = jnp.dot(x_ref[...], w_ref[...], preferred_element_type=jnp.float32)
    o_ref[...] = (acc + b_ref[...]).astype(o_ref.dtype)


def _unpack_zeros(qzeros, out_f):
    """(G, out//PACK) int32 -> (G, out) f32. Nibble s of word c -> column c*PACK + s."""
    parts = [jnp.bitwise_and(jnp.right_shift(qzeros, BITS * s), MAXQ) for s in range(PACK)]
    z = jnp.stack(parts, axis=-1).reshape(qzeros.shape[0], -1)
    return z[:, :out_f].astype(jnp.float32)


def quant_linear_v3(x, qweight, qzeros, scales, bias=None, *, bits=BITS,
                    tm=None, tn=None, compute_dtype=jnp.bfloat16):
    """x: (..., infeatures).  qweight/qzeros/scales/bias in QuantLinearV3 layout."""
    assert bits == BITS, "only 4-bit packing implemented"
    in_f = qweight.shape[0] * PACK
    out_f = qweight.shape[1]
    g = scales.shape[0]
    assert in_f % g == 0, "infeatures must be divisible by the number of groups"
    group_size = in_f // g
    assert group_size % PACK == 0, "group_size must be a multiple of 8 (= 32 // bits)"

    orig_shape = x.shape
    x2 = x.reshape(-1, in_f)
    m = x2.shape[0]

    if tn is None:
        tn = 256 if out_f % 256 == 0 else 128
    if tm is None:
        tm = 256 if m >= 256 else _round_up(m, 8)

    m_p = _round_up(m, tm)
    out_p = _round_up(out_f, tn)

    if m_p != m:
        x2 = jnp.pad(x2, ((0, m_p - m), (0, 0)))
    x2 = x2.astype(compute_dtype)     # bf16 feed: halves x HBM traffic, MXU-native.

    zeros_f32 = _unpack_zeros(qzeros, out_f)              # tiny (G, out)
    sc_f32 = scales.astype(jnp.float32)
    if bias is None:
        bias = jnp.zeros((out_f,), jnp.float32)
    b_f32 = bias.reshape(1, out_f).astype(jnp.float32)
    qw = qweight
    if out_p != out_f:
        pad_n = out_p - out_f
        qw = jnp.pad(qw, ((0, 0), (0, pad_n)))
        zeros_f32 = jnp.pad(zeros_f32, ((0, 0), (0, pad_n)))
        sc_f32 = jnp.pad(sc_f32, ((0, 0), (0, pad_n)))
        b_f32 = jnp.pad(b_f32, ((0, 0), (0, pad_n)))

    cbytes = jnp.dtype(compute_dtype).itemsize
    est = (2 * tm * in_f * cbytes            # x tile (double-buffered)
           + 2 * (in_f // PACK) * tn * 4     # packed weight tile (double-buffered)
           + in_f * tn * cbytes              # dequantized weight scratch
           + 2 * in_f * tn * 4               # unpack intermediates (transient)
           + 2 * tm * tn * 4                 # output tile (double-buffered)
           + 8 * g * tn * 4 + 8 * tn * 4)    # zeros / scales / bias
    vmem_limit = int(min(max(est * 5 // 4, 32 * 1024 * 1024), 64 * 1024 * 1024))
    # TODO(synk): for very large infeatures (K*tn scratch approaching v7x's 64 MiB VMEM),
    # add a K reduction grid axis (multiple of group_size) with an f32 accumulator
    # instead of holding full-K tiles.

    out = pl.pallas_call(
        quantlinear_kernel,
        out_shape=jax.ShapeDtypeStruct((m_p, out_p), x.dtype),
        grid_spec=pltpu.PrefetchScalarGridSpec(
            num_scalar_prefetch=0,
            grid=(out_p // tn, m_p // tm),                  # (N tiles, M tiles); M innermost
            in_specs=[
                pl.BlockSpec((tm, in_f), lambda j, i: (i, 0)),            # x tile, full K
                pl.BlockSpec((in_f // PACK, tn), lambda j, i: (0, j)),    # packed weights
                pl.BlockSpec((g, tn), lambda j, i: (0, j)),               # zero points
                pl.BlockSpec((g, tn), lambda j, i: (0, j)),               # scales
                pl.BlockSpec((1, tn), lambda j, i: (0, j)),               # bias
            ],
            out_specs=pl.BlockSpec((tm, tn), lambda j, i: (i, j)),
            scratch_shapes=[pltpu.VMEM((in_f, tn), compute_dtype)],       # dequant weight
        ),
        compiler_params=pltpu.CompilerParams(
            dimension_semantics=("parallel", "arbitrary"),
            vmem_limit_bytes=vmem_limit,
        ),
    )(x2, qw, zeros_f32, sc_f32, b_f32)

    out = out[:m, :out_f]
    return out.reshape(*orig_shape[:-1], out_f)


def pack_weights_np(w_int, z_int, bits=BITS):
    """Numpy glue mirroring QuantLinearV3.pack's bit packing."""
    pack = 32 // bits
    w_np = np.asarray(w_int).astype(np.uint32)          # (in, out)
    z_np = np.asarray(z_int).astype(np.uint32)          # (G, out)
    in_f, out_f = w_np.shape
    g = z_np.shape[0]
    qweight = np.zeros((in_f // pack, out_f), dtype=np.uint32)
    for s in range(pack):
        qweight |= w_np[s::pack, :] << (bits * s)
    qzeros = np.zeros((g, out_f // pack), dtype=np.uint32)
    for s in range(pack):
        qzeros |= z_np[:, s::pack] << (bits * s)
    return jnp.asarray(qweight.view(np.int32)), jnp.asarray(qzeros.view(np.int32))


if __name__ == "__main__":
    # Small shapes consistent with the module (in/out divisible by 32).
    B, S = 2, 8
    IN, OUT = 128, 256
    GROUP = 32
    G = IN // GROUP

    key = jax.random.PRNGKey(0)
    k1, k2, k3, k4, k5 = jax.random.split(key, 5)

    # Deterministic synthetic quantized parameters.
    w_int = jax.random.randint(k1, (IN, OUT), 0, MAXQ + 1, dtype=jnp.int32)
    z_int = jax.random.randint(k2, (G, OUT), 0, MAXQ + 1, dtype=jnp.int32)
    scales = (jax.random.uniform(k3, (G, OUT), jnp.float32) * 0.05 + 0.01).astype(jnp.float16)
    bias = (jax.random.normal(k4, (OUT,), jnp.float32) * 0.1).astype(jnp.float16)
    x = jax.random.normal(k5, (B, S, IN), jnp.float32)

    qweight, qzeros = pack_weights_np(w_int, z_int)

    out = quant_linear_v3(x, qweight, qzeros, scales, bias)
    out = jax.block_until_ready(out)

    # Pure-JAX reference (same math as the torch forward; matmul mirrored in bf16 to
    # match the kernel's MXU compute dtype — torch itself casts the weight to x.dtype).
    sc32 = scales.astype(jnp.float32)
    w_deq = ((w_int.reshape(G, GROUP, OUT) - z_int.reshape(G, 1, OUT)).astype(jnp.float32)
             * sc32.reshape(G, 1, OUT)).reshape(IN, OUT)
    ref = jnp.dot(x.reshape(-1, IN).astype(jnp.bfloat16), w_deq.astype(jnp.bfloat16),
                  preferred_element_type=jnp.float32) + bias.astype(jnp.float32)[None, :]
    ref = ref.reshape(B, S, OUT).astype(x.dtype)

    assert out.shape == (B, S, OUT) and out.dtype == x.dtype
    err = float(jnp.max(jnp.abs(out.astype(jnp.float32) - ref.astype(jnp.float32))))
    assert err < 2e-2, err
    print("KERNEL_OK")
</pallas_src>

<mosaic_0001>
module attributes {stable_mosaic.version = 11 : i64} {
  func.func @quantlinear_kernel(%arg0: i32, %arg1: i32, %arg2: memref<16x128xbf16, #tpu.memory_space<vmem>>, %arg3: memref<16x256xi32, #tpu.memory_space<vmem>>, %arg4: memref<4x256xf32, #tpu.memory_space<vmem>>, %arg5: memref<4x256xf32, #tpu.memory_space<vmem>>, %arg6: memref<1x256xf32, #tpu.memory_space<vmem>>, %arg7: memref<16x256xf32, #tpu.memory_space<vmem>>, %arg8: memref<128x256xbf16, #tpu.memory_space<vmem>>) attributes {dimension_semantics = [#tpu.dimension_semantics<parallel>, #tpu.dimension_semantics<arbitrary>], iteration_bounds = array<i64: 1, 1>, scalar_prefetch = 0 : i64, scratch_operands = 1 : i64, tpu.core_type = #tpu.core_type<tc>, window_params = [{transform_indices = @transform_0, window_bounds = array<i64: 16, 128>}, {transform_indices = @transform_1, window_bounds = array<i64: 16, 256>}, {transform_indices = @transform_2, window_bounds = array<i64: 4, 256>}, {transform_indices = @transform_3, window_bounds = array<i64: 4, 256>}, {transform_indices = @transform_4, window_bounds = array<i64: 1, 256>}, {transform_indices = @transform_5, window_bounds = array<i64: 16, 256>}]} {
    %c0_i32 = arith.constant 0 : i32
    %0 = arith.cmpi eq, %arg1, %c0_i32 : i32
    %1 = arith.extui %0 : i1 to i32
    %c0_i32_0 = arith.constant 0 : i32
    %2 = arith.cmpi ne, %1, %c0_i32_0 : i32
    scf.if %2 {
      %c0_8 = arith.constant 0 : index
      %c0_9 = arith.constant 0 : index
      %10 = vector.load %arg3[%c0_8, %c0_9] : memref<16x256xi32, #tpu.memory_space<vmem>>, vector<16x256xi32>
      %c0_i32_10 = arith.constant 0 : i32
      %11 = vector.broadcast %c0_i32_10 : i32 to vector<16x256xi32>
      %12 = arith.shrsi %10, %11 : vector<16x256xi32>
      %c15_i32 = arith.constant 15 : i32
      %13 = vector.broadcast %c15_i32 : i32 to vector<16x256xi32>
      %14 = arith.andi %12, %13 : vector<16x256xi32>
      %c4_i32 = arith.constant 4 : i32
      %15 = vector.broadcast %c4_i32 : i32 to vector<16x256xi32>
      %16 = arith.shrsi %10, %15 : vector<16x256xi32>
      %c15_i32_11 = arith.constant 15 : i32
      %17 = vector.broadcast %c15_i32_11 : i32 to vector<16x256xi32>
      %18 = arith.andi %16, %17 : vector<16x256xi32>
      %c8_i32 = arith.constant 8 : i32
      %19 = vector.broadcast %c8_i32 : i32 to vector<16x256xi32>
      %20 = arith.shrsi %10, %19 : vector<16x256xi32>
      %c15_i32_12 = arith.constant 15 : i32
      %21 = vector.broadcast %c15_i32_12 : i32 to vector<16x256xi32>
      %22 = arith.andi %20, %21 : vector<16x256xi32>
      %c12_i32 = arith.constant 12 : i32
      %23 = vector.broadcast %c12_i32 : i32 to vector<16x256xi32>
      %24 = arith.shrsi %10, %23 : vector<16x256xi32>
      %c15_i32_13 = arith.constant 15 : i32
      %25 = vector.broadcast %c15_i32_13 : i32 to vector<16x256xi32>
      %26 = arith.andi %24, %25 : vector<16x256xi32>
      %c16_i32 = arith.constant 16 : i32
      %27 = vector.broadcast %c16_i32 : i32 to vector<16x256xi32>
      %28 = arith.shrsi %10, %27 : vector<16x256xi32>
      %c15_i32_14 = arith.constant 15 : i32
      %29 = vector.broadcast %c15_i32_14 : i32 to vector<16x256xi32>
      %30 = arith.andi %28, %29 : vector<16x256xi32>
      %c20_i32 = arith.constant 20 : i32
      %31 = vector.broadcast %c20_i32 : i32 to vector<16x256xi32>
      %32 = arith.shrsi %10, %31 : vector<16x256xi32>
      %c15_i32_15 = arith.constant 15 : i32
      %33 = vector.broadcast %c15_i32_15 : i32 to vector<16x256xi32>
      %34 = arith.andi %32, %33 : vector<16x256xi32>
      %c24_i32 = arith.constant 24 : i32
      %35 = vector.broadcast %c24_i32 : i32 to vector<16x256xi32>
      %36 = arith.shrsi %10, %35 : vector<16x256xi32>
      %c15_i32_16 = arith.constant 15 : i32
      %37 = vector.broadcast %c15_i32_16 : i32 to vector<16x256xi32>
      %38 = arith.andi %36, %37 : vector<16x256xi32>
      %c28_i32 = arith.constant 28 : i32
      %39 = vector.broadcast %c28_i32 : i32 to vector<16x256xi32>
      %40 = arith.shrsi %10, %39 : vector<16x256xi32>
      %c15_i32_17 = arith.constant 15 : i32
      %41 = vector.broadcast %c15_i32_17 : i32 to vector<16x256xi32>
      %42 = arith.andi %40, %41 : vector<16x256xi32>
      %43 = vector.shape_cast %14 : vector<16x256xi32> to vector<16x1x256xi32>
      %44 = vector.shape_cast %18 : vector<16x256xi32> to vector<16x1x256xi32>
      %45 = vector.shape_cast %22 : vector<16x256xi32> to vector<16x1x256xi32>
      %46 = vector.shape_cast %26 : vector<16x256xi32> to vector<16x1x256xi32>
      %47 = vector.shape_cast %30 : vector<16x256xi32> to vector<16x1x256xi32>
      %48 = vector.shape_cast %34 : vector<16x256xi32> to vector<16x1x256xi32>
      %49 = vector.shape_cast %38 : vector<16x256xi32> to vector<16x1x256xi32>
      %50 = vector.shape_cast %42 : vector<16x256xi32> to vector<16x1x256xi32>
      %51 = tpu.concatenate %43, %44, %45, %46, %47, %48, %49, %50 in 1 : vector<16x1x256xi32>, vector<16x1x256xi32>, vector<16x1x256xi32>, vector<16x1x256xi32>, vector<16x1x256xi32>, vector<16x1x256xi32>, vector<16x1x256xi32>, vector<16x1x256xi32> -> vector<16x8x256xi32>
      %52 = vector.shape_cast %51 : vector<16x8x256xi32> to vector<4x32x256xi32>
      %c0_18 = arith.constant 0 : index
      %c0_19 = arith.constant 0 : index
      %53 = vector.load %arg4[%c0_18, %c0_19] : memref<4x256xf32, #tpu.memory_space<vmem>>, vector<4x256xf32>
      %c0_20 = arith.constant 0 : index
      %c0_21 = arith.constant 0 : index
      %54 = vector.load %arg5[%c0_20, %c0_21] : memref<4x256xf32, #tpu.memory_space<vmem>>, vector<4x256xf32>
      %55 = arith.sitofp %52 : vector<4x32x256xi32> to vector<4x32x256xf32>
      %56 = vector.shape_cast %53 : vector<4x256xf32> to vector<4x1x256xf32>
      %57 = vector.broadcast %56 : vector<4x1x256xf32> to vector<4x32x256xf32>
      %58 = arith.subf %55, %57 : vector<4x32x256xf32>
      %59 = vector.shape_cast %54 : vector<4x256xf32> to vector<4x1x256xf32>
      %60 = vector.broadcast %59 : vector<4x1x256xf32> to vector<4x32x256xf32>
      %61 = arith.mulf %58, %60 : vector<4x32x256xf32>
      %62 = vector.shape_cast %61 : vector<4x32x256xf32> to vector<128x256xf32>
      %63 = arith.truncf %62 : vector<128x256xf32> to vector<128x256xbf16>
      %c0_22 = arith.constant 0 : index
      %c0_23 = arith.constant 0 : index
      %64 = vector.load %arg8[%c0_22, %c0_23] : memref<128x256xbf16, #tpu.memory_space<vmem>>, vector<128x256xbf16>
      tpu.vector_store %arg8[%c0_22, %c0_23], %63 {strides = array<i32>} : memref<128x256xbf16, #tpu.memory_space<vmem>>, vector<128x256xbf16>,
    } else {
    }
    %c0 = arith.constant 0 : index
    %c0_1 = arith.constant 0 : index
    %3 = vector.load %arg2[%c0, %c0_1] : memref<16x128xbf16, #tpu.memory_space<vmem>>, vector<16x128xbf16>
    %c0_2 = arith.constant 0 : index
    %c0_3 = arith.constant 0 : index
    %4 = vector.load %arg8[%c0_2, %c0_3] : memref<128x256xbf16, #tpu.memory_space<vmem>>, vector<128x256xbf16>
    %cst = arith.constant dense<0.000000e+00> : vector<16x256xf32>
    %5 = tpu.matmul %3, %4, %cst {dimension_numbers = #tpu.dot_dimension_numbers<[1], [0], [0], [1], [0, 0, 1, 1], [], []>} : vector<16x128xbf16>, vector<128x256xbf16>, vector<16x256xf32> -> vector<16x256xf32>
    %c0_4 = arith.constant 0 : index
    %c0_5 = arith.constant 0 : index
    %6 = vector.load %arg6[%c0_4, %c0_5] : memref<1x256xf32, #tpu.memory_space<vmem>>, vector<1x256xf32>
    %7 = vector.broadcast %6 : vector<1x256xf32> to vector<16x256xf32>
    %8 = arith.addf %5, %7 : vector<16x256xf32>
    %c0_6 = arith.constant 0 : index
    %c0_7 = arith.constant 0 : index
    %9 = vector.load %arg7[%c0_6, %c0_7] : memref<16x256xf32, #tpu.memory_space<vmem>>, vector<16x256xf32>
    tpu.vector_store %arg7[%c0_6, %c0_7], %8 {strides = array<i32>} : memref<16x256xf32, #tpu.memory_space<vmem>>, vector<16x256xf32>,
    return
  }
  func.func @transform_0(%arg0: i32, %arg1: i32) -> (i32, i32) {
    %c0_i32 = arith.constant 0 : i32
    %c0_i32_0 = arith.constant 0 : i32
    return %arg1, %c0_i32 : i32, i32
  }
  func.func @transform_1(%arg0: i32, %arg1: i32) -> (i32, i32) {
    %c0_i32 = arith.constant 0 : i32
    %c0_i32_0 = arith.constant 0 : i32
    return %c0_i32, %arg0 : i32, i32
  }
  func.func @transform_2(%arg0: i32, %arg1: i32) -> (i32, i32) {
    %c0_i32 = arith.constant 0 : i32
    %c0_i32_0 = arith.constant 0 : i32
    return %c0_i32, %arg0 : i32, i32
  }
  func.func @transform_3(%arg0: i32, %arg1: i32) -> (i32, i32) {
    %c0_i32 = arith.constant 0 : i32
    %c0_i32_0 = arith.constant 0 : i32
    return %c0_i32, %arg0 : i32, i32
  }
  func.func @transform_4(%arg0: i32, %arg1: i32) -> (i32, i32) {
    %c0_i32 = arith.constant 0 : i32
    %c0_i32_0 = arith.constant 0 : i32
    return %c0_i32, %arg0 : i32, i32
  }
  func.func @transform_5(%arg0: i32, %arg1: i32) -> (i32, i32) {
    %c0_i32 = arith.constant 0 : i32
    return %arg1, %arg0 : i32, i32
  }
}

</mosaic_0001>

<bundles_post_ra>
// kernel: tpu_custom_call.1
= control target key start
LH: loop header
LB: loop body
LE: loop exit
PB: predicated region body
PF: predicated region fallthrough
CT: control target
= control target key end

     0   :  { %10 = vsyncpa [#allocation4], 0  ;;  %s4305_s0 = inlined_call_operand.hbm [shape: bf16[16,128], index: 0, kind: input, shape index: {}]   ;;  %s4306_s1 = inlined_call_operand.hbm [shape: s32[16,256], index: 1, kind: input, shape index: {}]   ;;  %s4307_s2 = inlined_call_operand.hbm [shape: f32[4,256], index: 2, kind: input, shape index: {}]   ;;  %s4308_s3 = inlined_call_operand.vmem [shape: f32[4,256], index: 3, kind: input, shape index: {}]   ;;  %s4309_s4 = inlined_call_operand.vmem [shape: f32[1,256], index: 4, kind: input, shape index: {}]   ;;  %s4310_s5 = inlined_call_operand.hbm [shape: f32[16,256], index: 5, kind: output, shape index: {}]  }
   0x1   :  { %11 = vsyncpa [#allocation7], 0 }
   0x2   :  { %12 = vsyncpa [#allocation5], 0  ;;  %s2657_s18 = smov [#allocation6]   ;;  %s2563_s22 = scalar_lea.hbm %s4306_s1, 512 }
   0x3   :  { %s30_s19 = sshll.u32 %s2657_s18, 4  ;;  %p2564_p0 = scmp.ne.s32.totalorder %s4306_s1, %s2563_s22  ;;  %s31_s19 = int_to_ptr.vmem [resolvable:$true] %s30_s19 }
   0x4   :  { %p2567_p1 = scmp.lt.u32.totalorder %s2563_s22, %s4306_s1 }
   0x6   :  { %p2569_p2 = pnand %p2567_p1, %p2564_p0 }
   0x8   :  { %2572 = shalt.err (!%p2569_p2)
}
   0x9   :  { %s2573_s27 = scalar_lea.vmem %s31_s19, 512  ;;  %p2578_p4 = scmp.lt.s32.totalorder %s31_s19, %s31_s19 }
   0xa   :  { %p2574_p3 = scmp.ne.s32.totalorder %s31_s19, %s2573_s27  ;;  %p2579_p5 = scmp.lt.s32.totalorder %s2573_s27, %s2573_s27 }
   0xc   :  { %p2580_p6 = por %p2579_p5, %p2578_p4 }
   0xe   :  { %p2581_p7 = pnand %p2580_p6, %p2574_p3 }
  0x10   :  { %2584 = shalt.err (!%p2581_p7)
}
  0x11   :  { %s2658_s28 = smov 256   ;;  %s2659_s29 = smov 16  }
  0x12   :  { %36 = dma.hbm_to_vmem [thread:$0]  %s4306_s1, 512, %s31_s19, [#allocation7], %s2658_s28, %s2658_s28, %s2659_s29  }
  0x13   :  { %s2660_s7 = smov [#allocation3]   ;;  %s2585_s11 = scalar_lea.hbm %s4305_s0, 128 }
  0x14   :  { %s18_s8 = sshll.u32 %s2660_s7, 4  ;;  %p2586_p8 = scmp.ne.s32.totalorder %s4305_s0, %s2585_s11  ;;  %s19_s8 = int_to_ptr.vmem [resolvable:$true] %s18_s8 }
  0x15   :  { %p2589_p9 = scmp.lt.u32.totalorder %s2585_s11, %s4305_s0 }
  0x17   :  { %p2591_p10 = pnand %p2589_p9, %p2586_p8 }
  0x19   :  { %2594 = shalt.err (!%p2591_p10)
}
  0x1a   :  { %s2595_s16 = scalar_lea.vmem %s19_s8, 128  ;;  %p2600_p12 = scmp.lt.s32.totalorder %s19_s8, %s19_s8 }
  0x1b   :  { %p2596_p11 = scmp.ne.s32.totalorder %s19_s8, %s2595_s16  ;;  %p2601_p13 = scmp.lt.s32.totalorder %s2595_s16, %s2595_s16 }
  0x1d   :  { %p2602_p0 = por %p2601_p13, %p2600_p12 }
  0x1f   :  { %p2603_p1 = pnand %p2602_p0, %p2596_p11 }
  0x21   :  { %2606 = shalt.err (!%p2603_p1)
}
  0x22   :  { %s2661_s1 = smov 64   ;;  %s2662_s17 = smov 4  }
  0x23   :  { %24 = dma.hbm_to_vmem [thread:$0]  %s4305_s0, 128, %s19_s8, [#allocation4], %s2661_s1, %s2661_s1, %s2662_s17  }
  0x24   :  { %s2663_s20 = smov [#allocation8]   ;;  %s2607_s24 = scalar_lea.hbm %s4307_s2, 128 }
  0x25   :  { %s43_s21 = sshll.u32 %s2663_s20, 4  ;;  %p2608_p2 = scmp.ne.s32.totalorder %s4307_s2, %s2607_s24  ;;  %s44_s21 = int_to_ptr.vmem [resolvable:$true] %s43_s21 }
  0x26   :  { %p2611_p3 = scmp.lt.u32.totalorder %s2607_s24, %s4307_s2 }
  0x28   :  { %p2613_p4 = pnand %p2611_p3, %p2608_p2 }
  0x2a   :  { %2616 = shalt.err (!%p2613_p4)
}
  0x2b   :  { %s2617_s6 = scalar_lea.vmem %s44_s21, 128  ;;  %p2622_p6 = scmp.lt.s32.totalorder %s44_s21, %s44_s21 }
  0x2c   :  { %p2618_p5 = scmp.ne.s32.totalorder %s44_s21, %s2617_s6  ;;  %p2623_p7 = scmp.lt.s32.totalorder %s2617_s6, %s2617_s6 }
  0x2e   :  { %p2624_p8 = por %p2623_p7, %p2622_p6 }
  0x30   :  { %p2625_p9 = pnand %p2624_p8, %p2618_p5 }
  0x32   :  { %2628 = shalt.err (!%p2625_p9)
}
  0x33   :  { %46 = dma.hbm_to_vmem [thread:$0]  %s4307_s2, 128, %s44_s21, [#allocation7]  }
  0x34   :  { %2651 = dma.done.wait [#allocation4], 128  }
  0x35   :  { %2652 = vsyncadd [#allocation4], 4294967168 }
  0x36   :  { %2653 = dma.done.wait [#allocation7], 640  }
  0x37   :  { %2654 = vsyncadd [#allocation7], 4294966656  ;;  %v134_v0 = vlaneseq  ;;  %v2664_v1 = vmov 1966171168   ;;  %v2736_v5 = vld [vmem:[#allocation6] sm:$0xff]  ;;  %v2738_v6 = vld [vmem:[#allocation6 + $0x8] sm:$0xff] }
  0x38   :  { %v132_v2 = vunpack.c.l.s4 %v2664_v1  ;;  %v4313_v10 = vand.u32 15, %v2736_v5  ;;  %v4314_v11 = vand.u32 15, %v2738_v6  ;;  %v73_v12 = vshra.s32 %v2736_v5, 4  ;;  %s2666_s10 = smov [#allocation9]  }
  0x39   :  { %v135_v4 = vshrl.u32 %v134_v0, 7  ;;  %v74_v13 = vshra.s32 %v2738_v6, 4  ;;  %v81_v14 = vshra.s32 %v2736_v5, 8  ;;  %v82_v15 = vshra.s32 %v2738_v6, 8  ;;  %s2532_s11 = sshll.u32 %s2666_s10, 4  ;;  %s2533_s11 = int_to_ptr.vmem [resolvable:$true] %s2532_s11 }
  0x3a   :  { %v133_v3 = vunpack.c.0.s8 %v132_v2  ;;  %v89_v16 = vshra.s32 %v2736_v5, 12  ;;  %v90_v17 = vshra.s32 %v2738_v6, 12  ;;  %v2754_v18 = vand.u32 15, %v73_v12  ;;  %p2634_p11 = scmp.lt.s32.totalorder %s2533_s11, %s2533_s11 }
  0x3b   :  { %v2742_v8 = vsub.s32 0, %v135_v4  ;;  %v2744_v9 = vsub.s32 1, %v135_v4  ;;  %v2756_v19 = vand.u32 15, %v74_v13  ;;  %v97_v20 = vshra.s32 %v2736_v5, 16 }
  0x3c   :  { %v2740_v7 = vsub.s32 %v133_v3, %v135_v4  ;;  %v98_v21 = vshra.s32 %v2738_v6, 16  ;;  %v2760_v22 = vand.u32 15, %v81_v14  ;;  %v2762_v23 = vand.u32 15, %v82_v15 }
  0x3d   :  { %v2764_v24 = vand.u32 15, %v89_v16  ;;  %v2766_v25 = vand.u32 15, %v90_v17  ;;  %v2768_v26 = vand.u32 15, %v97_v20  ;;  %v105_v28 = vshra.s32 %v2736_v5, 20 }
  0x3e   :  { %v2770_v27 = vand.u32 15, %v98_v21  ;;  %v106_v29 = vshra.s32 %v2738_v6, 20  ;;  %v113_v30 = vshra.s32 %v2736_v5, 24  ;;  %v114_v31 = vshra.s32 %v2738_v6, 24 }
  0x3f   :  { %v4311_v32 = vshrl.u32 %v2736_v5, 28  ;;  %v4312_v33 = vshrl.u32 %v2738_v6, 28  ;;  %v2778_v34 = vand.u32 15, %v105_v28  ;;  %v129_v36 = vcombine.low %v4313_v10, %v4314_v11 }
  0x40   :  { %v2780_v35 = vand.u32 15, %v106_v29  ;;  %v229_v37 = vcombine.low %v2754_v18, %v2756_v19  ;;  %v2788_v38 = vand.u32 15, %v113_v30  ;;  %v2790_v39 = vand.u32 15, %v114_v31 }
  0x41   :  { %v329_v40 = vcombine.low %v2760_v22, %v2762_v23  ;;  %v429_v41 = vcombine.low %v2764_v24, %v2766_v25  ;;  %v137_v42 = vrot.slane %v129_v36, %v2740_v7  ;;  %v529_v44 = vcombine.low %v2768_v26, %v2770_v27 }
  0x42   :  { %v237_v43 = vrot.slane %v229_v37, %v2740_v7  ;;  %v629_v45 = vcombine.low %v2778_v34, %v2780_v35  ;;  %v729_v48 = vcombine.low %v2788_v38, %v2790_v39  ;;  %v829_v49 = vcombine.low %v4311_v32, %v4312_v33 }
  0x43   :  { %v337_v46 = vrot.slane %v329_v40, %v2740_v7  ;;  %v437_v47 = vrot.slane %v429_v41, %v2740_v7  ;;  %v145_v50 = vcombine.high %v137_v42, %v137_v42  ;;  %v2811_v51 = vrot.slane %v137_v42, %v2740_v7 }
  0x44   :  { %v245_v52 = vcombine.high %v237_v43, %v237_v43  ;;  %v2814_v53 = vrot.slane %v237_v43, %v2740_v7  ;;  %vm1953_vm0 = vcmask 1040384   ;;  %vm1986_vm1 = vcmask 1041408   ;;  %v2878_v43 = vld.sshfl [vmem:[#allocation8] sm:$0xff pattern:$0x75316420] }
  0x45   :  { %v345_v54 = vcombine.high %v337_v46, %v337_v46  ;;  %v2817_v55 = vrot.slane %v337_v46, %v2740_v7  ;;  %v445_v56 = vcombine.high %v437_v47, %v437_v47  ;;  %v2820_v57 = vrot.slane %v437_v47, %v2740_v7 }
  0x46   :  { %v2823_v58 = vrot.slane %v145_v50, %v2740_v7  ;;  %v2826_v59 = vrot.slane %v245_v52, %v2740_v7  ;;  %v537_v60 = vrot.slane %v529_v44, %v2740_v7  ;;  %v637_v61 = vrot.slane %v629_v45, %v2740_v7 }
  0x47   :  { %vm2019_vm2 = vcmask 1042432   ;;  %v2831_v62 = vrot.slane %v345_v54, %v2740_v7  ;;  %v2834_v63 = vrot.slane %v445_v56, %v2740_v7  ;;  %v737_v0 = vrot.slane %v729_v48, %v2740_v7  ;;  %v2891_v48 = vld.sshfl [vmem:[%s4308_s3] sm:$0xff pattern:$0x75316420] }
  0x48   :  { %v837_v1 = vrot.slane %v829_v49, %v2740_v7  ;;  %vm2052_vm3 = vcmask 1043456   ;;  %v545_v2 = vcombine.high %v537_v60, %v537_v60  ;;  %v2839_v3 = vrot.slane %v537_v60, %v2740_v7  ;;  %4324 = vst [vmem:[#allocation13_spill] sm:$0xff] %v2891_v48 }
  0x49   :  { %v645_v4 = vcombine.high %v637_v61, %v637_v61  ;;  %v2842_v12 = vrot.slane %v637_v61, %v2740_v7  ;;  %vm2085_vm4 = vcmask 1044480   ;;  %v745_v13 = vcombine.high %v737_v0, %v737_v0 }
  0x4a   :  { %v2845_v14 = vrot.slane %v737_v0, %v2740_v7  ;;  %v845_v15 = vcombine.high %v837_v1, %v837_v1  ;;  %v2848_v16 = vrot.slane %v837_v1, %v2740_v7  ;;  %vm2118_vm5 = vcmask 1045504  }
  0x4b   :  { %v2851_v17 = vrot.slane %v545_v2, %v2740_v7  ;;  %v2854_v20 = vrot.slane %v645_v4, %v2740_v7  ;;  %v936_v21 = vrot.slane %v2811_v51, %v2744_v9  ;;  %v944_v28 = vrot.slane %v2823_v58, %v2744_v9 }
  0x4c   :  { %vm2151_vm6 = vcmask 1046528   ;;  %v2861_v29 = vrot.slane %v745_v13, %v2740_v7  ;;  %v2864_v30 = vrot.slane %v845_v15, %v2740_v7  ;;  %v1064_v31 = vrot.slane %v2814_v53, %v2744_v9 }
  0x4d   :  { %v1072_v36 = vrot.slane %v2826_v59, %v2744_v9  ;;  %v1192_v37 = vrot.slane %v2817_v55, %v2744_v9  ;;  %v1200_v40 = vrot.slane %v2831_v62, %v2744_v9  ;;  %v1320_v41 = vrot.slane %v2820_v57, %v2744_v9 }
  0x4e   :  { %v1328_v42 = vrot.slane %v2834_v63, %v2744_v9  ;;  %v1448_v44 = vrot.slane %v2839_v3, %v2744_v9  ;;  %v1456_v45 = vrot.slane %v2851_v17, %v2744_v9  ;;  %v1576_v46 = vrot.slane %v2842_v12, %v2744_v9 }
  0x4f   :  { %v1584_v47 = vrot.slane %v2854_v20, %v2744_v9  ;;  %v1704_v49 = vrot.slane %v2845_v14, %v2744_v9  ;;  %v1712_v50 = vrot.slane %v2861_v29, %v2744_v9  ;;  %v1832_v52 = vrot.slane %v2848_v16, %v2744_v9 }
  0x50   :  { %v1840_v54 = vrot.slane %v2864_v30, %v2744_v9  ;;  %v1955_v56 = vsel %vm1953_vm0, %v936_v21, %v1064_v31  ;;  %v1957_v60 = vsel %vm1953_vm0, %v944_v28, %v1072_v36  ;;  %v2907_v0 = vrot.slane %v2878_v43, %v2740_v7 }
  0x51   :  { %v1988_v1 = vsel %vm1986_vm1, %v1955_v56, %v1192_v37  ;;  %v1990_v2 = vsel %vm1986_vm1, %v1957_v60, %v1200_v40  ;;  %v2915_v13 = vrot.slane %v2891_v48, %v2740_v7  ;;  %v932_v31 = vrot.slane %v2811_v51, %v2742_v8 }
  0x52   :  { %v2021_v15 = vsel %vm2019_vm2, %v1988_v1, %v1320_v41  ;;  %v2023_v21 = vsel %vm2019_vm2, %v1990_v2, %v1328_v42  ;;  %v2921_v28 = vrot.slane %v2907_v0, %v2744_v9  ;;  %v940_v41 = vrot.slane %v2823_v58, %v2742_v8 }
  0x53   :  { %4325 = vst [vmem:[#allocation14_spill] sm:$0xff] %v2915_v13  ;;  %v2054_v36 = vsel %vm2052_vm3, %v2021_v15, %v1448_v44  ;;  %v2056_v37 = vsel %vm2052_vm3, %v2023_v21, %v1456_v45  ;;  %v2929_v40 = vrot.slane %v2915_v13, %v2744_v9  ;;  %v1060_v60 = vrot.slane %v2814_v53, %v2742_v8 }
  0x54   :  { %v2087_v42 = vsel %vm2085_vm4, %v2054_v36, %v1576_v46  ;;  %v2089_v56 = vsel %vm2085_vm4, %v2056_v37, %v1584_v47  ;;  %v1068_v1 = vrot.slane %v2826_v59, %v2742_v8  ;;  %v1188_v2 = vrot.slane %v2817_v55, %v2742_v8 }
  0x55   :  { %v2120_v44 = vsel %vm2118_vm5, %v2087_v42, %v1704_v49  ;;  %v2122_v45 = vsel %vm2118_vm5, %v2089_v56, %v1712_v50  ;;  %v1196_v15 = vrot.slane %v2831_v62, %v2742_v8  ;;  %v1316_v21 = vrot.slane %v2820_v57, %v2742_v8 }
  0x56   :  { %v2153_v46 = vsel %vm2151_vm6, %v2120_v44, %v1832_v52  ;;  %v2155_v47 = vsel %vm2151_vm6, %v2122_v45, %v1840_v54  ;;  %v1324_v36 = vrot.slane %v2834_v63, %v2742_v8  ;;  %v1444_v50 = vrot.slane %v2839_v3, %v2742_v8 }
  0x57   :  { %v2187_v37 = vcvt.s32.f32 %v2153_v46  ;;  %v2189_v49 = vcvt.s32.f32 %v2155_v47  ;;  %v1452_v42 = vrot.slane %v2851_v17, %v2742_v8  ;;  %v1572_v56 = vrot.slane %v2842_v12, %v2742_v8 }
  0x58   :  { %v1580_v52 = vrot.slane %v2854_v20, %v2742_v8  ;;  %v1700_v54 = vrot.slane %v2845_v14, %v2742_v8  ;;  %v1708_v44 = vrot.slane %v2861_v29, %v2742_v8  ;;  %v1828_v47 = vrot.slane %v2848_v16, %v2742_v8 }
  0x59   :  { %v2284_v45 = vsub.f32 %v2187_v37, %v2921_v28  ;;  %v2286_v46 = vsub.f32 %v2189_v49, %v2921_v28  ;;  %v1836_v4 = vrot.slane %v2864_v30, %v2742_v8  ;;  %v1954_v61 = vsel %vm1953_vm0, %v932_v31, %v1060_v60 }
  0x5a   :  { %v1956_v32 = vsel %vm1953_vm0, %v940_v41, %v1068_v1  ;;  %v2973_v33 = vrot.slane %v2907_v0, %v2742_v8  ;;  %v2977_v10 = vrot.slane %v2915_v13, %v2742_v8  ;;  %v1987_v11 = vsel %vm1986_vm1, %v1954_v61, %v1188_v2 }
  0x5b   :  { %v2381_v37 = vmul.f32 %v2929_v40, %v2284_v45  ;;  %v2383_v49 = vmul.f32 %v2929_v40, %v2286_v46  ;;  %v1989_v48 = vsel %vm1986_vm1, %v1956_v32, %v1196_v15  ;;  %v2020_v31 = vsel %vm2019_vm2, %v1987_v11, %v1316_v21 }
  0x5c   :  { %v2022_v41 = vsel %vm2019_vm2, %v1989_v48, %v1324_v36  ;;  %v2987_v60 = vcombine.high %v2811_v51, %v2811_v51  ;;  %v2991_v1 = vcombine.high %v2823_v58, %v2823_v58  ;;  %v2053_v45 = vsel %vm2052_vm3, %v2020_v31, %v1444_v50 }
  0x5d   :  { %v2413_v13 = vpack.c.bf16 %v2383_v49, %v2381_v37  ;;  %v2055_v46 = vsel %vm2052_vm3, %v2022_v41, %v1452_v42  ;;  %v2997_v32 = vcombine.high %v2814_v53, %v2814_v53  ;;  %v2086_v11 = vsel %vm2085_vm4, %v2053_v45, %v1572_v56 }
  0x5e   :  { %v2088_v48 = vsel %vm2085_vm4, %v2055_v46, %v1580_v52  ;;  %v3003_v51 = vcombine.high %v2826_v59, %v2826_v59  ;;  %v3007_v58 = vcombine.high %v2817_v55, %v2817_v55  ;;  %v2119_v61 = vsel %vm2118_vm5, %v2086_v11, %v1700_v54 }
  0x5f   :  { %2480 = vmatprep.subr.bf16.mxu0 %v2413_v13  ;;  %v2121_v2 = vsel %vm2118_vm5, %v2088_v48, %v1708_v44  ;;  %v3013_v53 = vcombine.high %v2831_v62, %v2831_v62  ;;  %v3017_v15 = vcombine.high %v2820_v57, %v2820_v57  ;;  %v2152_v59 = vsel %vm2151_vm6, %v2119_v61, %v1828_v47 }
  0x60   :  { %v2154_v21 = vsel %vm2151_vm6, %v2121_v2, %v1836_v4  ;;  %v3023_v55 = vcombine.high %v2834_v63, %v2834_v63  ;;  %v3027_v13 = vcombine.high %v2839_v3, %v2839_v3  ;;  %v2186_v36 = vcvt.s32.f32 %v2152_v59 }
  0x61   :  { %v2188_v50 = vcvt.s32.f32 %v2154_v21  ;;  %v3031_v62 = vcombine.high %v2851_v17, %v2851_v17  ;;  %v3035_v57 = vcombine.high %v2842_v12, %v2842_v12  ;;  %v3039_v4 = vcombine.high %v2854_v20, %v2854_v20 }
  0x62   :  { %v3043_v63 = vcombine.high %v2845_v14, %v2845_v14  ;;  %v3047_v3 = vcombine.high %v2861_v29, %v2861_v29  ;;  %v3051_v17 = vcombine.high %v2848_v16, %v2848_v16  ;;  %v2283_v42 = vsub.f32 %v2186_v36, %v2973_v33 }
  0x63   :  { %v2285_v12 = vsub.f32 %v2188_v50, %v2973_v33  ;;  %v3057_v20 = vcombine.high %v2864_v30, %v2864_v30  ;;  %v952_v14 = vrot.slane %v2987_v60, %v2744_v9  ;;  %v960_v56 = vrot.slane %v2991_v1, %v2744_v9 }
  0x64   :  { %v1080_v29 = vrot.slane %v2997_v32, %v2744_v9  ;;  %v1088_v16 = vrot.slane %v3003_v51, %v2744_v9  ;;  %v1208_v52 = vrot.slane %v3007_v58, %v2744_v9  ;;  %v2380_v54 = vmul.f32 %v2977_v10, %v2283_v42 }
  0x65   :  { %v2382_v30 = vmul.f32 %v2977_v10, %v2285_v12  ;;  %v1216_v44 = vrot.slane %v3013_v53, %v2744_v9  ;;  %v1336_v47 = vrot.slane %v3017_v15, %v2744_v9  ;;  %v1344_v37 = vrot.slane %v3023_v55, %v2744_v9 }
  0x66   :  { %v1464_v49 = vrot.slane %v3027_v13, %v2744_v9  ;;  %v1472_v31 = vrot.slane %v3031_v62, %v2744_v9  ;;  %v1592_v41 = vrot.slane %v3035_v57, %v2744_v9  ;;  %v1600_v46 = vrot.slane %v3039_v4, %v2744_v9 }
  0x67   :  { %v2412_v45 = vpack.c.bf16 %v2382_v30, %v2380_v54  ;;  %v1720_v11 = vrot.slane %v3043_v63, %v2744_v9  ;;  %v1728_v48 = vrot.slane %v3047_v3, %v2744_v9  ;;  %v1848_v61 = vrot.slane %v3051_v17, %v2744_v9 }
  0x68   :  { %v1856_v2 = vrot.slane %v3057_v20, %v2744_v9  ;;  %v1959_v59 = vsel %vm1953_vm0, %v952_v14, %v1080_v29  ;;  %v1961_v21 = vsel %vm1953_vm0, %v960_v56, %v1088_v16  ;;  %v948_v42 = vrot.slane %v2987_v60, %v2742_v8 }
  0x69   :  { %2481 = vmatpush1.bf16.msra.mxu0 %v2412_v45  ;;  %v1992_v36 = vsel %vm1986_vm1, %v1959_v59, %v1208_v52  ;;  %v1994_v50 = vsel %vm1986_vm1, %v1961_v21, %v1216_v44  ;;  %v956_v12 = vrot.slane %v2991_v1, %v2742_v8  ;;  %v1076_v14 = vrot.slane %v2997_v32, %v2742_v8 }
  0x6a   :  { %v2025_v54 = vsel %vm2019_vm2, %v1992_v36, %v1336_v47  ;;  %v2027_v30 = vsel %vm2019_vm2, %v1994_v50, %v1344_v37  ;;  %v1084_v56 = vrot.slane %v3003_v51, %v2742_v8  ;;  %v1204_v60 = vrot.slane %v3007_v58, %v2742_v8 }
  0x6b   :  { %v2058_v29 = vsel %vm2052_vm3, %v2025_v54, %v1464_v49  ;;  %v2060_v16 = vsel %vm2052_vm3, %v2027_v30, %v1472_v31  ;;  %v1212_v1 = vrot.slane %v3013_v53, %v2742_v8  ;;  %v1332_v32 = vrot.slane %v3017_v15, %v2742_v8 }
  0x6c   :  { %v2091_v52 = vsel %vm2085_vm4, %v2058_v29, %v1592_v41  ;;  %v2093_v44 = vsel %vm2085_vm4, %v2060_v16, %v1600_v46  ;;  %v1340_v51 = vrot.slane %v3023_v55, %v2742_v8  ;;  %v1460_v58 = vrot.slane %v3027_v13, %v2742_v8 }
  0x6d   :  { %v2124_v47 = vsel %vm2118_vm5, %v2091_v52, %v1720_v11  ;;  %v2126_v37 = vsel %vm2118_vm5, %v2093_v44, %v1728_v48  ;;  %v1468_v53 = vrot.slane %v3031_v62, %v2742_v8  ;;  %v1588_v15 = vrot.slane %v3035_v57, %v2742_v8 }
  0x6e   :  { %v2157_v49 = vsel %vm2151_vm6, %v2124_v47, %v1848_v61  ;;  %v2159_v31 = vsel %vm2151_vm6, %v2126_v37, %v1856_v2  ;;  %v1596_v55 = vrot.slane %v3039_v4, %v2742_v8  ;;  %v1716_v46 = vrot.slane %v3043_v63, %v2742_v8 }
  0x6f   :  { %v2191_v41 = vcvt.s32.f32 %v2157_v49  ;;  %v2193_v45 = vcvt.s32.f32 %v2159_v31  ;;  %v1724_v13 = vrot.slane %v3047_v3, %v2742_v8  ;;  %v1844_v62 = vrot.slane %v3051_v17, %v2742_v8 }
  0x70   :  { %v1852_v11 = vrot.slane %v3057_v20, %v2742_v8  ;;  %v1958_v48 = vsel %vm1953_vm0, %v948_v42, %v1076_v14  ;;  %v1960_v57 = vsel %vm1953_vm0, %v956_v12, %v1084_v56  ;;  %v4326_v17 = vand.u32 15, %v2738_v6 }
  0x71   :  { %v2288_v4 = vsub.f32 %v2191_v41, %v2921_v28  ;;  %v2290_v61 = vsub.f32 %v2193_v45, %v2921_v28  ;;  %v1991_v2 = vsel %vm1986_vm1, %v1958_v48, %v1204_v60  ;;  %v1993_v63 = vsel %vm1986_vm1, %v1960_v57, %v1212_v1 }
  0x72   :  { %v2024_v3 = vsel %vm2019_vm2, %v1991_v2, %v1332_v32  ;;  %v2026_v59 = vsel %vm2019_vm2, %v1993_v63, %v1340_v51  ;;  %v4327_v20 = vand.u32 15, %v2736_v5  ;;  %v230_v36 = vcombine.high %v2754_v18, %v2756_v19 }
  0x73   :  { %v2385_v50 = vmul.f32 %v2929_v40, %v2288_v4  ;;  %v2387_v28 = vmul.f32 %v2929_v40, %v2290_v61  ;;  %v2057_v42 = vsel %vm2052_vm3, %v2024_v3, %v1460_v58  ;;  %v2059_v12 = vsel %vm2052_vm3, %v2026_v59, %v1468_v53 }
  0x74   :  { %v130_v21 = vcombine.high %v4327_v20, %v4326_v17  ;;  %v2090_v54 = vsel %vm2085_vm4, %v2057_v42, %v1588_v15  ;;  %v2092_v30 = vsel %vm2085_vm4, %v2059_v12, %v1596_v55  ;;  %v244_v56 = vrot.slane %v230_v36, %v2740_v7 }
  0x75   :  { %v2415_v29 = vpack.c.bf16 %v2387_v28, %v2385_v50  ;;  %v2123_v16 = vsel %vm2118_vm5, %v2090_v54, %v1716_v46  ;;  %v2125_v18 = vsel %vm2118_vm5, %v2092_v30, %v1724_v13  ;;  %v330_v19 = vcombine.high %v2760_v22, %v2762_v23 }
  0x76   :  { %v144_v14 = vrot.slane %v130_v21, %v2740_v7  ;;  %v2156_v40 = vsel %vm2151_vm6, %v2123_v16, %v1844_v62  ;;  %v2158_v60 = vsel %vm2151_vm6, %v2125_v18, %v1852_v11  ;;  %v246_v51 = vcombine.high %v244_v56, %v244_v56 }
  0x77   :  { %2482 = vmatprep.subr.bf16.mxu0 %v2415_v29  ;;  %v2190_v44 = vcvt.s32.f32 %v2156_v40  ;;  %v2192_v32 = vcvt.s32.f32 %v2158_v60  ;;  %v3171_v47 = vrot.slane %v244_v56, %v2740_v7  ;;  %v344_v22 = vrot.slane %v330_v19, %v2740_v7 }
  0x78   :  { %v146_v1 = vcombine.high %v144_v14, %v144_v14  ;;  %v3168_v52 = vrot.slane %v144_v14, %v2740_v7  ;;  %v430_v23 = vcombine.high %v2764_v24, %v2766_v25  ;;  %v530_v58 = vcombine.high %v2768_v26, %v2770_v27 }
  0x79   :  { %v2287_v53 = vsub.f32 %v2190_v44, %v2973_v33  ;;  %v2289_v49 = vsub.f32 %v2192_v32, %v2973_v33  ;;  %v3184_v31 = vrot.slane %v246_v51, %v2740_v7  ;;  %v630_v15 = vcombine.high %v2778_v34, %v2780_v35 }
  0x7a   :  { %v3174_v37 = vrot.slane %v146_v1, %v2740_v7  ;;  %v346_v55 = vcombine.high %v344_v22, %v344_v22  ;;  %v3189_v41 = vrot.slane %v344_v22, %v2740_v7  ;;  %v444_v45 = vrot.slane %v430_v23, %v2740_v7  ;;  %v4332_v23 = vld [vmem:[#allocation13_spill] sm:$0xff] }
  0x7b   :  { %v544_v24 = vrot.slane %v530_v58, %v2740_v7  ;;  %v2384_v25 = vmul.f32 %v2977_v10, %v2287_v53  ;;  %v2386_v26 = vmul.f32 %v2977_v10, %v2289_v49  ;;  %v644_v27 = vrot.slane %v630_v15, %v2740_v7 }
  0x7c   :  { %v730_v33 = vcombine.high %v2788_v38, %v2790_v39  ;;  %v3199_v46 = vrot.slane %v346_v55, %v2740_v7  ;;  %v446_v34 = vcombine.high %v444_v45, %v444_v45  ;;  %v3202_v35 = vrot.slane %v444_v45, %v2740_v7 }
  0x7d   :  { %v546_v13 = vcombine.high %v544_v24, %v544_v24  ;;  %v2414_v62 = vpack.c.bf16 %v2386_v26, %v2384_v25  ;;  %v3205_v11 = vrot.slane %v544_v24, %v2740_v7  ;;  %v646_v48 = vcombine.high %v644_v27, %v644_v27 }
  0x7e   :  { %v3208_v10 = vrot.slane %v644_v27, %v2740_v7  ;;  %v3211_v57 = vrot.slane %v446_v34, %v2740_v7  ;;  %v744_v39 = vrot.slane %v730_v33, %v2740_v7  ;;  %v4328_v4 = vshrl.u32 %v2738_v6, 28 }
  0x7f   :  { %v3214_v38 = vrot.slane %v546_v13, %v2740_v7  ;;  %v4329_v61 = vshrl.u32 %v2736_v5, 28  ;;  %2483 = vmatpush1.bf16.msra.mxu0 %v2414_v62  ;;  %v3222_v63 = vrot.slane %v646_v48, %v2740_v7  ;;  %v968_v3 = vrot.slane %v3168_v52, %v2744_v9 }
  0x80   :  { %v976_v59 = vrot.slane %v3174_v37, %v2744_v9  ;;  %v1096_v17 = vrot.slane %v3171_v47, %v2744_v9  ;;  %v746_v20 = vcombine.high %v744_v39, %v744_v39  ;;  %v3231_v21 = vrot.slane %v744_v39, %v2740_v7 }
  0x81   :  { %v830_v2 = vcombine.high %v4329_v61, %v4328_v4  ;;  %v1104_v6 = vrot.slane %v3184_v31, %v2744_v9  ;;  %v1224_v36 = vrot.slane %v3189_v41, %v2744_v9  ;;  %v1232_v50 = vrot.slane %v3199_v46, %v2744_v9 }
  0x82   :  { %v1352_v28 = vrot.slane %v3202_v35, %v2744_v9  ;;  %v1360_v42 = vrot.slane %v3211_v57, %v2744_v9  ;;  %v3245_v12 = vrot.slane %v746_v20, %v2740_v7  ;;  %v1480_v14 = vrot.slane %v3205_v11, %v2744_v9 }
  0x83   :  { %v844_v5 = vrot.slane %v830_v2, %v2740_v7  ;;  %v1488_v56 = vrot.slane %v3214_v38, %v2744_v9  ;;  %v1608_v29 = vrot.slane %v3208_v10, %v2744_v9  ;;  %v1616_v16 = vrot.slane %v3222_v63, %v2744_v9 }
  0x84   :  { %v1736_v18 = vrot.slane %v3231_v21, %v2744_v9  ;;  %v1744_v40 = vrot.slane %v3245_v12, %v2744_v9  ;;  %v1963_v1 = vsel %vm1953_vm0, %v968_v3, %v1096_v17  ;;  %v1965_v44 = vsel %vm1953_vm0, %v976_v59, %v1104_v6 }
  0x85   :  { %v846_v54 = vcombine.high %v844_v5, %v844_v5  ;;  %v3248_v30 = vrot.slane %v844_v5, %v2740_v7  ;;  %v1996_v32 = vsel %vm1986_vm1, %v1963_v1, %v1224_v36  ;;  %v4330_v51 = vcombine.high %v2878_v43, %v2878_v43 }
  0x86   :  { %v4333_v58 = vcombine.high %v4332_v23, %v4332_v23  ;;  %v1998_v15 = vsel %vm1986_vm1, %v1965_v44, %v1232_v50  ;;  %v2029_v55 = vsel %vm2019_vm2, %v1996_v32, %v1352_v28  ;;  %v964_v45 = vrot.slane %v3168_v52, %v2742_v8 }
  0x87   :  { %v3261_v19 = vrot.slane %v846_v54, %v2740_v7  ;;  %v1864_v60 = vrot.slane %v3248_v30, %v2744_v9  ;;  %v3274_v22 = vrot.slane %v4330_v51, %v2740_v7  ;;  %v2031_v43 = vsel %vm2019_vm2, %v1998_v15, %v1360_v42 }
  0x88   :  { %v3280_v53 = vrot.slane %v4333_v58, %v2740_v7  ;;  %v2062_v24 = vsel %vm2052_vm3, %v2029_v55, %v1480_v14  ;;  %v2064_v27 = vsel %vm2052_vm3, %v2031_v43, %v1488_v56  ;;  %v972_v34 = vrot.slane %v3174_v37, %v2742_v8 }
  0x89   :  { %4331 = vst [vmem:[#allocation15_spill] sm:$0xff] %v3274_v22  ;;  %v1872_v49 = vrot.slane %v3261_v19, %v2744_v9  ;;  %v3292_v25 = vrot.slane %v3274_v22, %v2744_v9  ;;  %v2095_v33 = vsel %vm2085_vm4, %v2062_v24, %v1608_v29  ;;  %v1092_v13 = vrot.slane %v3171_v47, %v2742_v8 }
  0x8a   :  { %4334 = vst [vmem:[#allocation13_spill] sm:$0xff] %v3280_v53  ;;  %v3296_v26 = vrot.slane %v3280_v53, %v2744_v9  ;;  %v2097_v62 = vsel %vm2085_vm4, %v2064_v27, %v1616_v16  ;;  %v2128_v48 = vsel %vm2118_vm5, %v2095_v33, %v1736_v18  ;;  %v1100_v39 = vrot.slane %v3184_v31, %v2742_v8 }
  0x8b   :  { %v1220_v4 = vrot.slane %v3189_v41, %v2742_v8  ;;  %v2130_v61 = vsel %vm2118_vm5, %v2097_v62, %v1744_v40  ;;  %v2161_v2 = vsel %vm2151_vm6, %v2128_v48, %v1864_v60  ;;  %v1228_v3 = vrot.slane %v3199_v46, %v2742_v8 }
  0x8c   :  { %v1348_v59 = vrot.slane %v3202_v35, %v2742_v8  ;;  %v2163_v17 = vsel %vm2151_vm6, %v2130_v61, %v1872_v49  ;;  %v2195_v20 = vcvt.s32.f32 %v2161_v2  ;;  %v1356_v5 = vrot.slane %v3211_v57, %v2742_v8 }
  0x8d   :  { %v1476_v6 = vrot.slane %v3205_v11, %v2742_v8  ;;  %v2197_v36 = vcvt.s32.f32 %v2163_v17  ;;  %v1484_v50 = vrot.slane %v3214_v38, %v2742_v8  ;;  %v1604_v28 = vrot.slane %v3208_v10, %v2742_v8 }
  0x8e   :  { %v1612_v42 = vrot.slane %v3222_v63, %v2742_v8  ;;  %v2292_v54 = vsub.f32 %v2195_v20, %v3292_v25  ;;  %v1732_v14 = vrot.slane %v3231_v21, %v2742_v8  ;;  %v1740_v56 = vrot.slane %v3245_v12, %v2742_v8 }
  0x8f   :  { %v1860_v29 = vrot.slane %v3248_v30, %v2742_v8  ;;  %v2294_v16 = vsub.f32 %v2197_v36, %v3292_v25  ;;  %v1868_v18 = vrot.slane %v3261_v19, %v2742_v8  ;;  %v1962_v40 = vsel %vm1953_vm0, %v964_v45, %v1092_v13 }
  0x90   :  { %v1964_v60 = vsel %vm1953_vm0, %v972_v34, %v1100_v39  ;;  %v2389_v1 = vmul.f32 %v3296_v26, %v2292_v54  ;;  %v1995_v44 = vsel %vm1986_vm1, %v1962_v40, %v1220_v4  ;;  %v3344_v51 = vrot.slane %v3274_v22, %v2742_v8 }
  0x91   :  { %v1997_v32 = vsel %vm1986_vm1, %v1964_v60, %v1228_v3  ;;  %v2391_v23 = vmul.f32 %v3296_v26, %v2294_v16  ;;  %v2028_v58 = vsel %vm2019_vm2, %v1995_v44, %v1348_v59  ;;  %v3351_v15 = vrot.slane %v3280_v53, %v2742_v8 }
  0x92   :  { %v2030_v49 = vsel %vm2019_vm2, %v1997_v32, %v1356_v5  ;;  %v2061_v55 = vsel %vm2052_vm3, %v2028_v58, %v1476_v6  ;;  %v3357_v43 = vcombine.high %v3168_v52, %v3168_v52  ;;  %v3361_v24 = vcombine.high %v3174_v37, %v3174_v37 }
  0x93   :  { %v2063_v45 = vsel %vm2052_vm3, %v2030_v49, %v1484_v50  ;;  %v2417_v27 = vpack.c.bf16 %v2391_v23, %v2389_v1  ;;  %v2094_v33 = vsel %vm2085_vm4, %v2061_v55, %v1604_v28  ;;  %v3367_v13 = vcombine.high %v3171_v47, %v3171_v47 }
  0x94   :  { %v2096_v34 = vsel %vm2085_vm4, %v2063_v45, %v1612_v42  ;;  %v2127_v62 = vsel %vm2118_vm5, %v2094_v33, %v1732_v14  ;;  %v3373_v52 = vcombine.high %v3184_v31, %v3184_v31  ;;  %v3377_v37 = vcombine.high %v3189_v41, %v3189_v41 }
  0x95   :  { %v2129_v48 = vsel %vm2118_vm5, %v2096_v34, %v1740_v56  ;;  %2484 = vmatprep.subr.bf16.mxu0 %v2417_v27  ;;  %v2160_v39 = vsel %vm2151_vm6, %v2127_v62, %v1860_v29  ;;  %v3383_v47 = vcombine.high %v3199_v46, %v3199_v46  ;;  %v3387_v61 = vcombine.high %v3202_v35, %v3202_v35 }
  0x96   :  { %v2162_v4 = vsel %vm2151_vm6, %v2129_v48, %v1868_v18  ;;  %v2194_v2 = vcvt.s32.f32 %v2160_v39  ;;  %v3391_v3 = vcombine.high %v3211_v57, %v3211_v57  ;;  %v3395_v41 = vcombine.high %v3205_v11, %v3205_v11 }
  0x97   :  { %v2196_v31 = vcvt.s32.f32 %v2162_v4  ;;  %v3399_v59 = vcombine.high %v3214_v38, %v3214_v38  ;;  %v3403_v46 = vcombine.high %v3208_v10, %v3208_v10  ;;  %v3407_v35 = vcombine.high %v3222_v63, %v3222_v63 }
  0x98   :  { %v3411_v57 = vcombine.high %v3231_v21, %v3231_v21  ;;  %v2291_v17 = vsub.f32 %v2194_v2, %v3344_v51  ;;  %v3417_v38 = vcombine.high %v3245_v12, %v3245_v12  ;;  %v3421_v10 = vcombine.high %v3248_v30, %v3248_v30 }
  0x99   :  { %v2293_v11 = vsub.f32 %v2196_v31, %v3344_v51  ;;  %v3425_v63 = vcombine.high %v3261_v19, %v3261_v19  ;;  %v984_v21 = vrot.slane %v3357_v43, %v2744_v9  ;;  %v992_v20 = vrot.slane %v3361_v24, %v2744_v9 }
  0x9a   :  { %v1112_v5 = vrot.slane %v3367_v13, %v2744_v9  ;;  %v2388_v12 = vmul.f32 %v3351_v15, %v2291_v17  ;;  %v1120_v30 = vrot.slane %v3373_v52, %v2744_v9  ;;  %v1240_v19 = vrot.slane %v3377_v37, %v2744_v9 }
  0x9b   :  { %v2390_v6 = vmul.f32 %v3351_v15, %v2293_v11  ;;  %v1248_v36 = vrot.slane %v3383_v47, %v2744_v9  ;;  %v1368_v50 = vrot.slane %v3387_v61, %v2744_v9  ;;  %v1376_v28 = vrot.slane %v3391_v3, %v2744_v9 }
  0x9c   :  { %v1496_v42 = vrot.slane %v3395_v41, %v2744_v9  ;;  %v1504_v14 = vrot.slane %v3399_v59, %v2744_v9  ;;  %v1624_v56 = vrot.slane %v3403_v46, %v2744_v9  ;;  %v1632_v29 = vrot.slane %v3407_v35, %v2744_v9 }
  0x9d   :  { %v2416_v54 = vpack.c.bf16 %v2390_v6, %v2388_v12  ;;  %v1752_v16 = vrot.slane %v3411_v57, %v2744_v9  ;;  %v1760_v18 = vrot.slane %v3417_v38, %v2744_v9  ;;  %v1880_v40 = vrot.slane %v3421_v10, %v2744_v9 }
  0x9e   :  { %v1888_v60 = vrot.slane %v3425_v63, %v2744_v9  ;;  %v1967_v1 = vsel %vm1953_vm0, %v984_v21, %v1112_v5  ;;  %v1969_v44 = vsel %vm1953_vm0, %v992_v20, %v1120_v30  ;;  %v980_v32 = vrot.slane %v3357_v43, %v2742_v8  ;;  %v3507_v5 = vld [vmem:[#allocation6 + $0x10] sm:$0xff] }
  0x9f   :  { %2485 = vmatpush1.bf16.msra.mxu0 %v2416_v54  ;;  %v988_v23 = vrot.slane %v3361_v24, %v2742_v8  ;;  %v2000_v58 = vsel %vm1986_vm1, %v1967_v1, %v1240_v19  ;;  %v2002_v49 = vsel %vm1986_vm1, %v1969_v44, %v1248_v36  ;;  %v1108_v55 = vrot.slane %v3367_v13, %v2742_v8 }
  0xa0   :  { %v1116_v45 = vrot.slane %v3373_v52, %v2742_v8  ;;  %v2033_v27 = vsel %vm2019_vm2, %v2000_v58, %v1368_v50  ;;  %v2035_v33 = vsel %vm2019_vm2, %v2002_v49, %v1376_v28  ;;  %v1236_v43 = vrot.slane %v3377_v37, %v2742_v8 }
  0xa1   :  { %v1244_v24 = vrot.slane %v3383_v47, %v2742_v8  ;;  %v2066_v34 = vsel %vm2052_vm3, %v2033_v27, %v1496_v42  ;;  %v2068_v62 = vsel %vm2052_vm3, %v2035_v33, %v1504_v14  ;;  %v1364_v13 = vrot.slane %v3387_v61, %v2742_v8 }
  0xa2   :  { %v1372_v48 = vrot.slane %v3391_v3, %v2742_v8  ;;  %v2099_v52 = vsel %vm2085_vm4, %v2066_v34, %v1624_v56  ;;  %v2101_v39 = vsel %vm2085_vm4, %v2068_v62, %v1632_v29  ;;  %v1492_v37 = vrot.slane %v3395_v41, %v2742_v8 }
  0xa3   :  { %v1500_v4 = vrot.slane %v3399_v59, %v2742_v8  ;;  %v2132_v47 = vsel %vm2118_vm5, %v2099_v52, %v1752_v16  ;;  %v2134_v2 = vsel %vm2118_vm5, %v2101_v39, %v1760_v18  ;;  %v1620_v61 = vrot.slane %v3403_v46, %v2742_v8 }
  0xa4   :  { %v1628_v31 = vrot.slane %v3407_v35, %v2742_v8  ;;  %v2165_v3 = vsel %vm2151_vm6, %v2132_v47, %v1880_v40  ;;  %v2167_v17 = vsel %vm2151_vm6, %v2134_v2, %v1888_v60  ;;  %v1748_v41 = vrot.slane %v3411_v57, %v2742_v8  ;;  %v3509_v35 = vld [vmem:[#allocation6 + $0x18] sm:$0xff] }
  0xa5   :  { %v1756_v59 = vrot.slane %v3417_v38, %v2742_v8  ;;  %v2199_v11 = vcvt.s32.f32 %v2165_v3  ;;  %v2201_v21 = vcvt.s32.f32 %v2167_v17  ;;  %v1876_v20 = vrot.slane %v3421_v10, %v2742_v8 }
  0xa6   :  { %v1884_v46 = vrot.slane %v3425_v63, %v2742_v8  ;;  %v1966_v12 = vsel %vm1953_vm0, %v980_v32, %v1108_v55  ;;  %v1968_v6 = vsel %vm1953_vm0, %v988_v23, %v1116_v45  ;;  %v4320_v57 = vand.u32 15, %v3507_v5 }
  0xa7   :  { %v4321_v38 = vand.u32 15, %v3509_v35  ;;  %v2296_v30 = vsub.f32 %v2199_v11, %v3292_v25  ;;  %v2298_v19 = vsub.f32 %v2201_v21, %v3292_v25  ;;  %v1999_v10 = vsel %vm1986_vm1, %v1966_v12, %v1236_v43 }
  0xa8   :  { %v2001_v63 = vsel %vm1986_vm1, %v1968_v6, %v1244_v24  ;;  %v2032_v36 = vsel %vm2019_vm2, %v1999_v10, %v1364_v13  ;;  %v75_v28 = vshra.s32 %v3507_v5, 4  ;;  %v76_v42 = vshra.s32 %v3509_v35, 4 }
  0xa9   :  { %v2034_v50 = vsel %vm2019_vm2, %v2001_v63, %v1372_v48  ;;  %v2393_v54 = vmul.f32 %v3296_v26, %v2296_v30  ;;  %v2395_v14 = vmul.f32 %v3296_v26, %v2298_v19  ;;  %v2065_v56 = vsel %vm2052_vm3, %v2032_v36, %v1492_v37 }
  0xaa   :  { %v2067_v25 = vsel %vm2052_vm3, %v2034_v50, %v1500_v4  ;;  %v2098_v29 = vsel %vm2085_vm4, %v2065_v56, %v1620_v61  ;;  %v3529_v18 = vand.u32 15, %v75_v28  ;;  %v3531_v40 = vand.u32 15, %v76_v42 }
  0xab   :  { %v2100_v16 = vsel %vm2085_vm4, %v2067_v25, %v1628_v31  ;;  %v2419_v60 = vpack.c.bf16 %v2395_v14, %v2393_v54  ;;  %v2131_v1 = vsel %vm2118_vm5, %v2098_v29, %v1748_v41  ;;  %v83_v32 = vshra.s32 %v3507_v5, 8 }
  0xac   :  { %v2133_v44 = vsel %vm2118_vm5, %v2100_v16, %v1756_v59  ;;  %v2164_v26 = vsel %vm2151_vm6, %v2131_v1, %v1876_v20  ;;  %v84_v58 = vshra.s32 %v3509_v35, 8  ;;  %v91_v49 = vshra.s32 %v3507_v5, 12 }
  0xad   :  { %v2166_v23 = vsel %vm2151_vm6, %v2133_v44, %v1884_v46  ;;  %2486 = vmatprep.subr.bf16.mxu0 %v2419_v60  ;;  %v2198_v55 = vcvt.s32.f32 %v2164_v26  ;;  %v3540_v27 = vand.u32 15, %v83_v32  ;;  %v92_v33 = vshra.s32 %v3509_v35, 12 }
  0xae   :  { %v2200_v45 = vcvt.s32.f32 %v2166_v23  ;;  %v3543_v43 = vand.u32 15, %v84_v58  ;;  %v3545_v24 = vand.u32 15, %v91_v49  ;;  %v99_v34 = vshra.s32 %v3507_v5, 16 }
  0xaf   :  { %v100_v62 = vshra.s32 %v3509_v35, 16  ;;  %v2295_v13 = vsub.f32 %v2198_v55, %v3344_v51  ;;  %v3551_v52 = vand.u32 15, %v92_v33  ;;  %v107_v39 = vshra.s32 %v3507_v5, 20 }
  0xb0   :  { %v2297_v48 = vsub.f32 %v2200_v45, %v3344_v51  ;;  %v3554_v37 = vand.u32 15, %v99_v34  ;;  %v108_v47 = vshra.s32 %v3509_v35, 20  ;;  %v115_v2 = vshra.s32 %v3507_v5, 24 }
  0xb1   :  { %v3556_v4 = vand.u32 15, %v100_v62  ;;  %v2392_v61 = vmul.f32 %v3351_v15, %v2295_v13  ;;  %v3562_v3 = vand.u32 15, %v107_v39  ;;  %v116_v51 = vshra.s32 %v3509_v35, 24 }
  0xb2   :  { %v2394_v31 = vmul.f32 %v3351_v15, %v2297_v48  ;;  %v3565_v17 = vand.u32 15, %v108_v47  ;;  %v3567_v41 = vand.u32 15, %v115_v2  ;;  %v4318_v59 = vshrl.u32 %v3507_v5, 28 }
  0xb3   :  { %v4319_v11 = vshrl.u32 %v3509_v35, 28  ;;  %v3571_v20 = vand.u32 15, %v116_v51  ;;  %v179_v15 = vcombine.low %v4320_v57, %v4321_v38  ;;  %v279_v46 = vcombine.low %v3529_v18, %v3531_v40 }
  0xb4   :  { %v2418_v21 = vpack.c.bf16 %v2394_v31, %v2392_v61  ;;  %v379_v12 = vcombine.low %v3540_v27, %v3543_v43  ;;  %v479_v6 = vcombine.low %v3545_v24, %v3551_v52  ;;  %v579_v30 = vcombine.low %v3554_v37, %v3556_v4 }
  0xb5   :  { %v679_v19 = vcombine.low %v3562_v3, %v3565_v17  ;;  %v187_v10 = vrot.slane %v179_v15, %v2740_v7  ;;  %v287_v63 = vrot.slane %v279_v46, %v2740_v7  ;;  %v779_v36 = vcombine.low %v3567_v41, %v3571_v20 }
  0xb6   :  { %2487 = vmatpush1.bf16.msra.mxu0 %v2418_v21  ;;  %v879_v50 = vcombine.low %v4318_v59, %v4319_v11  ;;  %v387_v28 = vrot.slane %v379_v12, %v2740_v7  ;;  %v487_v42 = vrot.slane %v479_v6, %v2740_v7  ;;  %v587_v54 = vrot.slane %v579_v30, %v2740_v7 }
  0xb7   :  { %v687_v14 = vrot.slane %v679_v19, %v2740_v7  ;;  %v195_v56 = vcombine.high %v187_v10, %v187_v10  ;;  %v3600_v25 = vrot.slane %v187_v10, %v2740_v7  ;;  %v295_v29 = vcombine.high %v287_v63, %v287_v63 }
  0xb8   :  { %v3603_v16 = vrot.slane %v287_v63, %v2740_v7  ;;  %v395_v60 = vcombine.high %v387_v28, %v387_v28  ;;  %v3606_v1 = vrot.slane %v387_v28, %v2740_v7  ;;  %v495_v44 = vcombine.high %v487_v42, %v487_v42 }
  0xb9   :  { %v3609_v32 = vrot.slane %v487_v42, %v2740_v7  ;;  %v3612_v26 = vrot.slane %v195_v56, %v2740_v7  ;;  %v3615_v23 = vrot.slane %v295_v29, %v2740_v7  ;;  %v595_v58 = vcombine.high %v587_v54, %v587_v54 }
  0xba   :  { %v3618_v49 = vrot.slane %v587_v54, %v2740_v7  ;;  %v3621_v55 = vrot.slane %v395_v60, %v2740_v7  ;;  %v3624_v45 = vrot.slane %v495_v44, %v2740_v7  ;;  %v695_v33 = vcombine.high %v687_v14, %v687_v14 }
  0xbb   :  { %v3627_v34 = vrot.slane %v687_v14, %v2740_v7  ;;  %v3630_v62 = vrot.slane %v595_v58, %v2740_v7  ;;  %v787_v13 = vrot.slane %v779_v36, %v2740_v7  ;;  %v887_v48 = vrot.slane %v879_v50, %v2740_v7 }
  0xbc   :  { %v1000_v39 = vrot.slane %v3600_v25, %v2744_v9  ;;  %v3637_v47 = vrot.slane %v695_v33, %v2740_v7  ;;  %v1008_v2 = vrot.slane %v3612_v26, %v2744_v9  ;;  %v1128_v61 = vrot.slane %v3603_v16, %v2744_v9 }
  0xbd   :  { %v1136_v31 = vrot.slane %v3615_v23, %v2744_v9  ;;  %v795_v51 = vcombine.high %v787_v13, %v787_v13  ;;  %v3646_v21 = vrot.slane %v787_v13, %v2740_v7  ;;  %v895_v15 = vcombine.high %v887_v48, %v887_v48 }
  0xbe   :  { %v3649_v46 = vrot.slane %v887_v48, %v2740_v7  ;;  %v1256_v12 = vrot.slane %v3606_v1, %v2744_v9  ;;  %v1264_v6 = vrot.slane %v3621_v55, %v2744_v9  ;;  %v1384_v30 = vrot.slane %v3609_v32, %v2744_v9  ;;  %v4335_v48 = vld [vmem:[#allocation14_spill] sm:$0xff] }
  0xbf   :  { %v1392_v19 = vrot.slane %v3624_v45, %v2744_v9  ;;  %v3660_v10 = vrot.slane %v795_v51, %v2740_v7  ;;  %v3663_v63 = vrot.slane %v895_v15, %v2740_v7  ;;  %v1512_v36 = vrot.slane %v3618_v49, %v2744_v9 }
  0xc0   :  { %v1520_v50 = vrot.slane %v3630_v62, %v2744_v9  ;;  %v1640_v28 = vrot.slane %v3627_v34, %v2744_v9  ;;  %v1648_v42 = vrot.slane %v3637_v47, %v2744_v9  ;;  %v1768_v54 = vrot.slane %v3646_v21, %v2744_v9 }
  0xc1   :  { %v1896_v14 = vrot.slane %v3649_v46, %v2744_v9  ;;  %v1776_v56 = vrot.slane %v3660_v10, %v2744_v9  ;;  %v1904_v29 = vrot.slane %v3663_v63, %v2744_v9  ;;  %v1971_v60 = vsel %vm1953_vm0, %v1000_v39, %v1128_v61 }
  0xc2   :  { %v1973_v44 = vsel %vm1953_vm0, %v1008_v2, %v1136_v31  ;;  %v2004_v58 = vsel %vm1986_vm1, %v1971_v60, %v1256_v12  ;;  %v2241_v13 = vcombine.high %v2907_v0, %v2907_v0  ;;  %v2338_v51 = vcombine.high %v4335_v48, %v4335_v48 }
  0xc3   :  { %v2006_v33 = vsel %vm1986_vm1, %v1973_v44, %v1264_v6  ;;  %v2037_v15 = vsel %vm2019_vm2, %v2004_v58, %v1384_v30  ;;  %v996_v11 = vrot.slane %v3600_v25, %v2742_v8  ;;  %v1004_v39 = vrot.slane %v3612_v26, %v2742_v8 }
  0xc4   :  { %v2039_v59 = vsel %vm2019_vm2, %v2006_v33, %v1392_v19  ;;  %v2070_v2 = vsel %vm2052_vm3, %v2037_v15, %v1512_v36  ;;  %v3698_v31 = vrot.slane %v2241_v13, %v2744_v9  ;;  %v3701_v0 = vrot.slane %v2338_v51, %v2744_v9 }
  0xc5   :  { %v2072_v61 = vsel %vm2052_vm3, %v2039_v59, %v1520_v50  ;;  %v2103_v12 = vsel %vm2085_vm4, %v2070_v2, %v1640_v28  ;;  %v1124_v30 = vrot.slane %v3603_v16, %v2742_v8  ;;  %v1132_v19 = vrot.slane %v3615_v23, %v2742_v8 }
  0xc6   :  { %v2105_v6 = vsel %vm2085_vm4, %v2072_v61, %v1648_v42  ;;  %v2136_v36 = vsel %vm2118_vm5, %v2103_v12, %v1768_v54  ;;  %v1252_v50 = vrot.slane %v3606_v1, %v2742_v8  ;;  %v1260_v60 = vrot.slane %v3621_v55, %v2742_v8 }
  0xc7   :  { %v2138_v59 = vsel %vm2118_vm5, %v2105_v6, %v1776_v56  ;;  %v2169_v28 = vsel %vm2151_vm6, %v2136_v36, %v1896_v14  ;;  %v1380_v44 = vrot.slane %v3609_v32, %v2742_v8  ;;  %v1388_v58 = vrot.slane %v3624_v45, %v2742_v8 }
  0xc8   :  { %v2171_v42 = vsel %vm2151_vm6, %v2138_v59, %v1904_v29  ;;  %v2203_v33 = vcvt.s32.f32 %v2169_v28  ;;  %v1508_v56 = vrot.slane %v3618_v49, %v2742_v8  ;;  %v1516_v48 = vrot.slane %v3630_v62, %v2742_v8 }
  0xc9   :  { %v2205_v54 = vcvt.s32.f32 %v2171_v42  ;;  %v1636_v15 = vrot.slane %v3627_v34, %v2742_v8  ;;  %v1644_v14 = vrot.slane %v3637_v47, %v2742_v8  ;;  %v1764_v29 = vrot.slane %v3646_v21, %v2742_v8 }
  0xca   :  { %v1772_v2 = vrot.slane %v3660_v10, %v2742_v8  ;;  %v2300_v61 = vsub.f32 %v2203_v33, %v3698_v31  ;;  %v1892_v6 = vrot.slane %v3649_v46, %v2742_v8  ;;  %v1900_v36 = vrot.slane %v3663_v63, %v2742_v8 }
  0xcb   :  { %v2302_v12 = vsub.f32 %v2205_v54, %v3698_v31  ;;  %v1970_v59 = vsel %vm1953_vm0, %v996_v11, %v1124_v30  ;;  %v1972_v28 = vsel %vm1953_vm0, %v1004_v39, %v1132_v19  ;;  %v3742_v42 = vrot.slane %v2241_v13, %v2742_v8 }
  0xcc   :  { %v3745_v57 = vrot.slane %v2338_v51, %v2742_v8  ;;  %v2397_v33 = vmul.f32 %v3701_v0, %v2300_v61  ;;  %v2003_v38 = vsel %vm1986_vm1, %v1970_v59, %v1252_v50  ;;  %v2005_v53 = vsel %vm1986_vm1, %v1972_v28, %v1260_v60 }
  0xcd   :  { %v2399_v54 = vmul.f32 %v3701_v0, %v2302_v12  ;;  %v2036_v22 = vsel %vm2019_vm2, %v2003_v38, %v1380_v44  ;;  %v2038_v11 = vsel %vm2019_vm2, %v2005_v53, %v1388_v58  ;;  %v3755_v39 = vcombine.high %v3600_v25, %v3600_v25 }
  0xce   :  { %v3759_v13 = vcombine.high %v3612_v26, %v3612_v26  ;;  %v2069_v30 = vsel %vm2052_vm3, %v2036_v22, %v1508_v56  ;;  %v2071_v19 = vsel %vm2052_vm3, %v2038_v11, %v1516_v48  ;;  %v3765_v50 = vcombine.high %v3603_v16, %v3603_v16 }
  0xcf   :  { %v2421_v51 = vpack.c.bf16 %v2399_v54, %v2397_v33  ;;  %v2102_v38 = vsel %vm2085_vm4, %v2069_v30, %v1636_v15  ;;  %v2104_v53 = vsel %vm2085_vm4, %v2071_v19, %v1644_v14  ;;  %v3771_v25 = vcombine.high %v3615_v23, %v3615_v23 }
  0xd0   :  { %v3775_v26 = vcombine.high %v3606_v1, %v3606_v1  ;;  %v2135_v22 = vsel %vm2118_vm5, %v2102_v38, %v1764_v29  ;;  %v2137_v60 = vsel %vm2118_vm5, %v2104_v53, %v1772_v2  ;;  %v3781_v16 = vcombine.high %v3621_v55, %v3621_v55 }
  0xd1   :  { %2488 = vmatprep.subr.bf16.mxu0 %v2421_v51  ;;  %v3785_v44 = vcombine.high %v3609_v32, %v3609_v32  ;;  %v2168_v23 = vsel %vm2151_vm6, %v2135_v22, %v1892_v6  ;;  %v2170_v58 = vsel %vm2151_vm6, %v2137_v60, %v1900_v36  ;;  %v3791_v1 = vcombine.high %v3624_v45, %v3624_v45 }
  0xd2   :  { %v3795_v56 = vcombine.high %v3618_v49, %v3618_v49  ;;  %v2202_v48 = vcvt.s32.f32 %v2168_v23  ;;  %v2204_v15 = vcvt.s32.f32 %v2170_v58  ;;  %v3799_v55 = vcombine.high %v3630_v62, %v3630_v62 }
  0xd3   :  { %v3803_v32 = vcombine.high %v3627_v34, %v3627_v34  ;;  %v3807_v14 = vcombine.high %v3637_v47, %v3637_v47  ;;  %v3811_v45 = vcombine.high %v3646_v21, %v3646_v21  ;;  %v3815_v49 = vcombine.high %v3660_v10, %v3660_v10 }
  0xd4   :  { %v3819_v62 = vcombine.high %v3649_v46, %v3649_v46  ;;  %v2299_v29 = vsub.f32 %v2202_v48, %v3742_v42  ;;  %v2301_v34 = vsub.f32 %v2204_v15, %v3742_v42  ;;  %v3825_v47 = vcombine.high %v3663_v63, %v3663_v63 }
  0xd5   :  { %v1016_v21 = vrot.slane %v3755_v39, %v2744_v9  ;;  %v1024_v2 = vrot.slane %v3759_v13, %v2744_v9  ;;  %v1144_v10 = vrot.slane %v3765_v50, %v2744_v9  ;;  %v1152_v46 = vrot.slane %v3771_v25, %v2744_v9 }
  0xd6   :  { %v1272_v61 = vrot.slane %v3775_v26, %v2744_v9  ;;  %v2396_v12 = vmul.f32 %v3745_v57, %v2299_v29  ;;  %v2398_v63 = vmul.f32 %v3745_v57, %v2301_v34  ;;  %v1280_v6 = vrot.slane %v3781_v16, %v2744_v9 }
  0xd7   :  { %v1400_v36 = vrot.slane %v3785_v44, %v2744_v9  ;;  %v1408_v59 = vrot.slane %v3791_v1, %v2744_v9  ;;  %v1528_v28 = vrot.slane %v3795_v56, %v2744_v9  ;;  %v1536_v33 = vrot.slane %v3799_v55, %v2744_v9 }
  0xd8   :  { %v1656_v54 = vrot.slane %v3803_v32, %v2744_v9  ;;  %v2420_v11 = vpack.c.bf16 %v2398_v63, %v2396_v12  ;;  %v1664_v51 = vrot.slane %v3807_v14, %v2744_v9  ;;  %v1784_v30 = vrot.slane %v3811_v45, %v2744_v9 }
  0xd9   :  { %v1792_v19 = vrot.slane %v3815_v49, %v2744_v9  ;;  %v1912_v38 = vrot.slane %v3819_v62, %v2744_v9  ;;  %v1920_v53 = vrot.slane %v3825_v47, %v2744_v9  ;;  %v1975_v22 = vsel %vm1953_vm0, %v1016_v21, %v1144_v10 }
  0xda   :  { %v1977_v60 = vsel %vm1953_vm0, %v1024_v2, %v1152_v46  ;;  %2489 = vmatpush1.bf16.msra.mxu0 %v2420_v11  ;;  %v2008_v23 = vsel %vm1986_vm1, %v1975_v22, %v1272_v61  ;;  %v1012_v48 = vrot.slane %v3755_v39, %v2742_v8  ;;  %v1020_v15 = vrot.slane %v3759_v13, %v2742_v8 }
  0xdb   :  { %v2010_v58 = vsel %vm1986_vm1, %v1977_v60, %v1280_v6  ;;  %v2041_v29 = vsel %vm2019_vm2, %v2008_v23, %v1400_v36  ;;  %v1140_v21 = vrot.slane %v3765_v50, %v2742_v8  ;;  %v1148_v2 = vrot.slane %v3771_v25, %v2742_v8 }
  0xdc   :  { %v2043_v34 = vsel %vm2019_vm2, %v2010_v58, %v1408_v59  ;;  %v2074_v10 = vsel %vm2052_vm3, %v2041_v29, %v1528_v28  ;;  %v1268_v39 = vrot.slane %v3775_v26, %v2742_v8  ;;  %v1276_v13 = vrot.slane %v3781_v16, %v2742_v8 }
  0xdd   :  { %v2076_v46 = vsel %vm2052_vm3, %v2043_v34, %v1536_v33  ;;  %v2107_v61 = vsel %vm2085_vm4, %v2074_v10, %v1656_v54  ;;  %v1396_v50 = vrot.slane %v3785_v44, %v2742_v8  ;;  %v1404_v25 = vrot.slane %v3791_v1, %v2742_v8 }
  0xde   :  { %v2109_v12 = vsel %vm2085_vm4, %v2076_v46, %v1664_v51  ;;  %v2140_v63 = vsel %vm2118_vm5, %v2107_v61, %v1784_v30  ;;  %v1524_v26 = vrot.slane %v3795_v56, %v2742_v8  ;;  %v1532_v16 = vrot.slane %v3799_v55, %v2742_v8 }
  0xdf   :  { %v2142_v6 = vsel %vm2118_vm5, %v2109_v12, %v1792_v19  ;;  %v2173_v36 = vsel %vm2151_vm6, %v2140_v63, %v1912_v38  ;;  %v1652_v44 = vrot.slane %v3803_v32, %v2742_v8  ;;  %v1660_v1 = vrot.slane %v3807_v14, %v2742_v8 }
  0xe0   :  { %v2175_v59 = vsel %vm2151_vm6, %v2142_v6, %v1920_v53  ;;  %v2207_v28 = vcvt.s32.f32 %v2173_v36  ;;  %v1780_v54 = vrot.slane %v3811_v45, %v2742_v8  ;;  %v1788_v56 = vrot.slane %v3815_v49, %v2742_v8 }
  0xe1   :  { %v2209_v33 = vcvt.s32.f32 %v2175_v59  ;;  %v1908_v55 = vrot.slane %v3819_v62, %v2742_v8  ;;  %v1916_v11 = vrot.slane %v3825_v47, %v2742_v8  ;;  %v1974_v51 = vsel %vm1953_vm0, %v1012_v48, %v1140_v21 }
  0xe2   :  { %v1976_v32 = vsel %vm1953_vm0, %v1020_v15, %v1148_v2  ;;  %v2304_v14 = vsub.f32 %v2207_v28, %v3698_v31  ;;  %v2007_v19 = vsel %vm1986_vm1, %v1974_v51, %v1268_v39  ;;  %v4336_v62 = vand.u32 15, %v3509_v35 }
  0xe3   :  { %v2306_v30 = vsub.f32 %v2209_v33, %v3698_v31  ;;  %v2009_v45 = vsel %vm1986_vm1, %v1976_v32, %v1276_v13  ;;  %v2040_v49 = vsel %vm2019_vm2, %v2007_v19, %v1396_v50  ;;  %v4337_v47 = vand.u32 15, %v3507_v5 }
  0xe4   :  { %v2042_v38 = vsel %vm2019_vm2, %v2009_v45, %v1404_v25  ;;  %v280_v22 = vcombine.high %v3529_v18, %v3531_v40  ;;  %v2401_v60 = vmul.f32 %v3701_v0, %v2304_v14  ;;  %v2073_v23 = vsel %vm2052_vm3, %v2040_v49, %v1524_v26 }
  0xe5   :  { %v180_v53 = vcombine.high %v4337_v47, %v4336_v62  ;;  %v2403_v31 = vmul.f32 %v3701_v0, %v2306_v30  ;;  %v2075_v58 = vsel %vm2052_vm3, %v2042_v38, %v1532_v16  ;;  %v2106_v48 = vsel %vm2085_vm4, %v2073_v23, %v1652_v44 }
  0xe6   :  { %v2108_v15 = vsel %vm2085_vm4, %v2075_v58, %v1660_v1  ;;  %v294_v34 = vrot.slane %v280_v22, %v2740_v7  ;;  %v2139_v2 = vsel %vm2118_vm5, %v2106_v48, %v1780_v54  ;;  %v380_v40 = vcombine.high %v3540_v27, %v3543_v43 }
  0xe7   :  { %v194_v29 = vrot.slane %v180_v53, %v2740_v7  ;;  %v2423_v21 = vpack.c.bf16 %v2403_v31, %v2401_v60  ;;  %v2141_v18 = vsel %vm2118_vm5, %v2108_v15, %v1788_v56  ;;  %v2172_v0 = vsel %vm2151_vm6, %v2139_v2, %v1908_v55 }
  0xe8   :  { %v2174_v10 = vsel %vm2151_vm6, %v2141_v18, %v1916_v11  ;;  %v2206_v39 = vcvt.s32.f32 %v2172_v0  ;;  %v296_v12 = vcombine.high %v294_v34, %v294_v34  ;;  %v394_v50 = vrot.slane %v380_v40, %v2740_v7 }
  0xe9   :  { %v196_v46 = vcombine.high %v194_v29, %v194_v29  ;;  %2490 = vmatprep.subr.bf16.mxu0 %v2423_v21  ;;  %v2208_v13 = vcvt.s32.f32 %v2174_v10  ;;  %v3936_v61 = vrot.slane %v194_v29, %v2740_v7  ;;  %v480_v25 = vcombine.high %v3545_v24, %v3551_v52  ;;  %v4340_v10 = vld [vmem:[#allocation15_spill] sm:$0xff] }
  0xea   :  { %v580_v27 = vcombine.high %v3554_v37, %v3556_v4  ;;  %v2303_v43 = vsub.f32 %v2206_v39, %v3742_v42  ;;  %v3946_v6 = vrot.slane %v294_v34, %v2740_v7  ;;  %v680_v26 = vcombine.high %v3562_v3, %v3565_v17  ;;  %v4341_v39 = vld [vmem:[#allocation13_spill] sm:$0xff] }
  0xeb   :  { %v2305_v63 = vsub.f32 %v2208_v13, %v3742_v42  ;;  %v3951_v16 = vrot.slane %v196_v46, %v2740_v7  ;;  %v396_v36 = vcombine.high %v394_v50, %v394_v50  ;;  %v494_v59 = vrot.slane %v480_v25, %v2740_v7 }
  0xec   :  { %v594_v24 = vrot.slane %v580_v27, %v2740_v7  ;;  %v2400_v52 = vmul.f32 %v3745_v57, %v2303_v43  ;;  %v694_v4 = vrot.slane %v680_v26, %v2740_v7  ;;  %v780_v42 = vcombine.high %v3567_v41, %v3571_v20 }
  0xed   :  { %v2402_v37 = vmul.f32 %v3745_v57, %v2305_v63  ;;  %v3961_v44 = vrot.slane %v296_v12, %v2740_v7  ;;  %v3964_v3 = vrot.slane %v394_v50, %v2740_v7  ;;  %v496_v17 = vcombine.high %v494_v59, %v494_v59 }
  0xee   :  { %v596_v1 = vcombine.high %v594_v24, %v594_v24  ;;  %v3967_v33 = vrot.slane %v396_v36, %v2740_v7  ;;  %v3970_v54 = vrot.slane %v494_v59, %v2740_v7  ;;  %v696_v57 = vcombine.high %v694_v4, %v694_v4 }
  0xef   :  { %v2422_v28 = vpack.c.bf16 %v2402_v37, %v2400_v52  ;;  %v3973_v56 = vrot.slane %v594_v24, %v2740_v7  ;;  %v3976_v41 = vrot.slane %v694_v4, %v2740_v7  ;;  %v794_v20 = vrot.slane %v780_v42, %v2740_v7 }
  0xf0   :  { %v4338_v55 = vshrl.u32 %v3509_v35, 28  ;;  %v4339_v11 = vshrl.u32 %v3507_v5, 28  ;;  %v3984_v32 = vrot.slane %v496_v17, %v2740_v7  ;;  %v3987_v14 = vrot.slane %v596_v1, %v2740_v7 }
  0xf1   :  { %2491 = vmatpush1.bf16.msra.mxu0 %v2422_v28  ;;  %v3990_v30 = vrot.slane %v696_v57, %v2740_v7  ;;  %v1032_v19 = vrot.slane %v3936_v61, %v2744_v9  ;;  %v796_v45 = vcombine.high %v794_v20, %v794_v20  ;;  %v3995_v49 = vrot.slane %v794_v20, %v2740_v7 }
  0xf2   :  { %v880_v51 = vcombine.high %v4339_v11, %v4338_v55  ;;  %v1160_v35 = vrot.slane %v3946_v6, %v2744_v9  ;;  %v1040_v38 = vrot.slane %v3951_v16, %v2744_v9  ;;  %v1168_v62 = vrot.slane %v3961_v44, %v2744_v9 }
  0xf3   :  { %v1288_v47 = vrot.slane %v3964_v3, %v2744_v9  ;;  %v1296_v53 = vrot.slane %v3967_v33, %v2744_v9  ;;  %v4009_v22 = vrot.slane %v796_v45, %v2740_v7  ;;  %v1416_v23 = vrot.slane %v3970_v54, %v2744_v9 }
  0xf4   :  { %v894_v5 = vrot.slane %v880_v51, %v2740_v7  ;;  %v1424_v58 = vrot.slane %v3984_v32, %v2744_v9  ;;  %v1544_v48 = vrot.slane %v3973_v56, %v2744_v9  ;;  %v1552_v15 = vrot.slane %v3987_v14, %v2744_v9 }
  0xf5   :  { %v1672_v29 = vrot.slane %v3976_v41, %v2744_v9  ;;  %v1680_v21 = vrot.slane %v3990_v30, %v2744_v9  ;;  %v1800_v2 = vrot.slane %v3995_v49, %v2744_v9  ;;  %v1979_v18 = vsel %vm1953_vm0, %v1032_v19, %v1160_v35 }
  0xf6   :  { %v896_v60 = vcombine.high %v894_v5, %v894_v5  ;;  %v4012_v31 = vrot.slane %v894_v5, %v2740_v7  ;;  %v1981_v40 = vsel %vm1953_vm0, %v1040_v38, %v1168_v62  ;;  %v2012_v0 = vsel %vm1986_vm1, %v1979_v18, %v1288_v47 }
  0xf7   :  { %v2242_v46 = vcombine.high %v4340_v10, %v4340_v10  ;;  %v2339_v13 = vcombine.high %v4341_v39, %v4341_v39  ;;  %v2014_v50 = vsel %vm1986_vm1, %v1981_v40, %v1296_v53  ;;  %v2045_v25 = vsel %vm2019_vm2, %v2012_v0, %v1416_v23 }
  0xf8   :  { %v4025_v34 = vrot.slane %v896_v60, %v2740_v7  ;;  %v1808_v7 = vrot.slane %v4009_v22, %v2744_v9  ;;  %v1928_v12 = vrot.slane %v4012_v31, %v2744_v9  ;;  %v2047_v43 = vsel %vm2019_vm2, %v2014_v50, %v1424_v58 }
  0xf9   :  { %v2078_v63 = vsel %vm2052_vm3, %v2045_v25, %v1544_v48  ;;  %v1028_v26 = vrot.slane %v3936_v61, %v2742_v8  ;;  %v2080_v36 = vsel %vm2052_vm3, %v2047_v43, %v1552_v15  ;;  %v4053_v24 = vrot.slane %v2242_v46, %v2744_v9 }
  0xfa   :  { %v1936_v27 = vrot.slane %v4025_v34, %v2744_v9  ;;  %v2111_v59 = vsel %vm2085_vm4, %v2078_v63, %v1672_v29  ;;  %v4056_v52 = vrot.slane %v2339_v13, %v2744_v9  ;;  %v2113_v37 = vsel %vm2085_vm4, %v2080_v36, %v1680_v21 }
  0xfb   :  { %v2144_v4 = vsel %vm2118_vm5, %v2111_v59, %v1800_v2  ;;  %v1036_v42 = vrot.slane %v3951_v16, %v2742_v8  ;;  %v1156_v17 = vrot.slane %v3946_v6, %v2742_v8  ;;  %v2146_v1 = vsel %vm2118_vm5, %v2113_v37, %v1808_v7 }
  0xfc   :  { %v2177_v28 = vsel %vm2151_vm6, %v2144_v4, %v1928_v12  ;;  %v1164_v57 = vrot.slane %v3961_v44, %v2742_v8  ;;  %v1284_v20 = vrot.slane %v3964_v3, %v2742_v8  ;;  %v2179_v55 = vsel %vm2151_vm6, %v2146_v1, %v1936_v27 }
  0xfd   :  { %v2211_v11 = vcvt.s32.f32 %v2177_v28  ;;  %v1292_v51 = vrot.slane %v3967_v33, %v2742_v8  ;;  %v1412_v19 = vrot.slane %v3970_v54, %v2742_v8  ;;  %v2213_v45 = vcvt.s32.f32 %v2179_v55 }
  0xfe   :  { %v1420_v5 = vrot.slane %v3984_v32, %v2742_v8  ;;  %v1540_v35 = vrot.slane %v3973_v56, %v2742_v8  ;;  %v1548_v38 = vrot.slane %v3987_v14, %v2742_v8  ;;  %v1668_v47 = vrot.slane %v3976_v41, %v2742_v8 }
  0xff   :  { %v2308_v62 = vsub.f32 %v2211_v11, %v4053_v24  ;;  %v1676_v53 = vrot.slane %v3990_v30, %v2742_v8  ;;  %v1796_v60 = vrot.slane %v3995_v49, %v2742_v8  ;;  %v2310_v23 = vsub.f32 %v2213_v45, %v4053_v24 }
 0x100   :  { %v1804_v58 = vrot.slane %v4009_v22, %v2742_v8  ;;  %v1978_v48 = vsel %vm1953_vm0, %v1028_v26, %v1156_v17  ;;  %v1980_v15 = vsel %vm1953_vm0, %v1036_v42, %v1164_v57  ;;  %v1924_v21 = vrot.slane %v4012_v31, %v2742_v8 }
 0x101   :  { %v2405_v29 = vmul.f32 %v4056_v52, %v2308_v62  ;;  %v2011_v2 = vsel %vm1986_vm1, %v1978_v48, %v1284_v20  ;;  %v2013_v18 = vsel %vm1986_vm1, %v1980_v15, %v1292_v51  ;;  %v2407_v40 = vmul.f32 %v4056_v52, %v2310_v23 }
 0x102   :  { %v1932_v0 = vrot.slane %v4025_v34, %v2742_v8  ;;  %v2044_v10 = vsel %vm2019_vm2, %v2011_v2, %v1412_v19  ;;  %v2046_v39 = vsel %vm2019_vm2, %v2013_v18, %v1420_v5  ;;  %v4106_v50 = vrot.slane %v2242_v46, %v2742_v8 }
 0x103   :  { %v2077_v7 = vsel %vm2052_vm3, %v2044_v10, %v1540_v35  ;;  %v2079_v12 = vsel %vm2052_vm3, %v2046_v39, %v1548_v38  ;;  %v4109_v25 = vrot.slane %v2339_v13, %v2742_v8  ;;  %v2425_v27 = vpack.c.bf16 %v2407_v40, %v2405_v29 }
 0x104   :  { %v2110_v43 = vsel %vm2085_vm4, %v2077_v7, %v1668_v47  ;;  %v2112_v63 = vsel %vm2085_vm4, %v2079_v12, %v1676_v53  ;;  %v4115_v26 = vcombine.high %v3936_v61, %v3936_v61  ;;  %v4121_v46 = vcombine.high %v3951_v16, %v3951_v16 }
 0x105   :  { %v2143_v36 = vsel %vm2118_vm5, %v2110_v43, %v1796_v60  ;;  %v2145_v59 = vsel %vm2118_vm5, %v2112_v63, %v1804_v58  ;;  %v4125_v13 = vcombine.high %v3946_v6, %v3946_v6  ;;  %2492 = vmatprep.subr.bf16.mxu0 %v2425_v27  ;;  %v4131_v61 = vcombine.high %v3961_v44, %v3961_v44 }
 0x106   :  { %v2176_v37 = vsel %vm2151_vm6, %v2143_v36, %v1924_v21  ;;  %v2178_v4 = vsel %vm2151_vm6, %v2145_v59, %v1932_v0  ;;  %v4135_v42 = vcombine.high %v3964_v3, %v3964_v3  ;;  %v4139_v1 = vcombine.high %v3967_v33, %v3967_v33 }
 0x107   :  { %v2210_v17 = vcvt.s32.f32 %v2176_v37  ;;  %v2212_v16 = vcvt.s32.f32 %v2178_v4  ;;  %v4143_v6 = vcombine.high %v3970_v54, %v3970_v54  ;;  %v4147_v28 = vcombine.high %v3984_v32, %v3984_v32 }
 0x108   :  { %v4151_v44 = vcombine.high %v3973_v56, %v3973_v56  ;;  %v4155_v3 = vcombine.high %v3987_v14, %v3987_v14  ;;  %v4159_v33 = vcombine.high %v3976_v41, %v3976_v41  ;;  %v4165_v32 = vcombine.high %v3990_v30, %v3990_v30 }
 0x109   :  { %v2307_v57 = vsub.f32 %v2210_v17, %v4106_v50  ;;  %v2309_v54 = vsub.f32 %v2212_v16, %v4106_v50  ;;  %v4169_v56 = vcombine.high %v3995_v49, %v3995_v49  ;;  %v4173_v14 = vcombine.high %v4009_v22, %v4009_v22 }
 0x10a   :  { %v4177_v41 = vcombine.high %v4012_v31, %v4012_v31  ;;  %v1048_v20 = vrot.slane %v4115_v26, %v2744_v9  ;;  %v1056_v55 = vrot.slane %v4121_v46, %v2744_v9  ;;  %v1176_v49 = vrot.slane %v4125_v13, %v2744_v9 }
 0x10b   :  { %v2404_v30 = vmul.f32 %v4109_v25, %v2307_v57  ;;  %v2406_v11 = vmul.f32 %v4109_v25, %v2309_v54  ;;  %v1184_v22 = vrot.slane %v4131_v61, %v2744_v9  ;;  %v4191_v31 = vcombine.high %v4025_v34, %v4025_v34 }
 0x10c   :  { %v1304_v51 = vrot.slane %v4135_v42, %v2744_v9  ;;  %v1312_v19 = vrot.slane %v4139_v1, %v2744_v9  ;;  %v1432_v5 = vrot.slane %v4143_v6, %v2744_v9  ;;  %v1440_v35 = vrot.slane %v4147_v28, %v2744_v9 }
 0x10d   :  { %v2424_v45 = vpack.c.bf16 %v2406_v11, %v2404_v30  ;;  %v1560_v38 = vrot.slane %v4151_v44, %v2744_v9  ;;  %v1568_v34 = vrot.slane %v4155_v3, %v2744_v9  ;;  %v1688_v62 = vrot.slane %v4159_v33, %v2744_v9 }
 0x10e   :  { %v1696_v47 = vrot.slane %v4165_v32, %v2744_v9  ;;  %v1816_v53 = vrot.slane %v4169_v56, %v2744_v9  ;;  %v1824_v60 = vrot.slane %v4173_v14, %v2744_v9  ;;  %v1944_v23 = vrot.slane %v4177_v41, %v2744_v9 }
 0x10f   :  { %2493 = vmatpush1.bf16.msra.mxu0 %v2424_v45  ;;  %v1983_v58 = vsel %vm1953_vm0, %v1048_v20, %v1176_v49  ;;  %v1985_v48 = vsel %vm1953_vm0, %v1056_v55, %v1184_v22  ;;  %v1952_v15 = vrot.slane %v4191_v31, %v2744_v9  ;;  %v1044_v2 = vrot.slane %v4115_v26, %v2742_v8 }
 0x110   :  { %v2016_v29 = vsel %vm1986_vm1, %v1983_v58, %v1304_v51  ;;  %v2018_v21 = vsel %vm1986_vm1, %v1985_v48, %v1312_v19  ;;  %v1052_v0 = vrot.slane %v4121_v46, %v2742_v8  ;;  %v1172_v10 = vrot.slane %v4125_v13, %v2742_v8  ;;  %v2562_v58 = vld [vmem:[#allocation3] sm:$0xff]  }
 0x111   :  { %v2049_v18 = vsel %vm2019_vm2, %v2016_v29, %v1432_v5  ;;  %v2051_v40 = vsel %vm2019_vm2, %v2018_v21, %v1440_v35  ;;  %v1180_v12 = vrot.slane %v4131_v61, %v2742_v8  ;;  %v1300_v27 = vrot.slane %v4135_v42, %v2742_v8  ;;  %v2462_v48 = vld [vmem:[%s4309_s4] sm:$0x3]  ;;  %s2629_s4 = scalar_lea.vmem %s2533_s11, 512 }
 0x112   :  { %v2082_v39 = vsel %vm2052_vm3, %v2049_v18, %v1560_v38  ;;  %v2084_v7 = vsel %vm2052_vm3, %v2051_v40, %v1568_v34  ;;  %v1308_v26 = vrot.slane %v4139_v1, %v2742_v8  ;;  %v1428_v36 = vrot.slane %v4143_v6, %v2742_v8  ;;  %p2630_p10 = scmp.ne.s32.totalorder %s2533_s11, %s2629_s4  ;;  %p2635_p12 = scmp.lt.s32.totalorder %s2629_s4, %s2629_s4 }
 0x113   :  { %v2115_v43 = vsel %vm2085_vm4, %v2082_v39, %v1688_v62  ;;  %v2117_v63 = vsel %vm2085_vm4, %v2084_v7, %v1696_v47  ;;  %v1436_v13 = vrot.slane %v4147_v28, %v2742_v8  ;;  %v1556_v37 = vrot.slane %v4151_v44, %v2742_v8 }
 0x114   :  { %v2148_v59 = vsel %vm2118_vm5, %v2115_v43, %v1816_v53  ;;  %v2150_v46 = vsel %vm2118_vm5, %v2117_v63, %v1824_v60  ;;  %v1564_v42 = vrot.slane %v4155_v3, %v2742_v8  ;;  %v1684_v17 = vrot.slane %v4159_v33, %v2742_v8  ;;  %p2636_p13 = por %p2635_p12, %p2634_p11 }
 0x115   :  { %v2181_v4 = vsel %vm2151_vm6, %v2148_v59, %v1944_v23  ;;  %v2183_v61 = vsel %vm2151_vm6, %v2150_v46, %v1952_v15  ;;  %v1692_v6 = vrot.slane %v4165_v32, %v2742_v8  ;;  %v1812_v28 = vrot.slane %v4169_v56, %v2742_v8 }
 0x116   :  { %v2215_v16 = vcvt.s32.f32 %v2181_v4  ;;  %v2217_v1 = vcvt.s32.f32 %v2183_v61  ;;  %v1820_v44 = vrot.slane %v4173_v14, %v2742_v8  ;;  %v1982_v57 = vsel %vm1953_vm0, %v1044_v2, %v1172_v10  ;;  %p2637_p0 = pnand %p2636_p13, %p2630_p10 }
 0x117   :  { %v1984_v54 = vsel %vm1953_vm0, %v1052_v0, %v1180_v12  ;;  %v2015_v33 = vsel %vm1986_vm1, %v1982_v57, %v1300_v27  ;;  %v2665_v30 = vmov 0   ;;  %v1940_v32 = vrot.slane %v4177_v41, %v2742_v8 }
 0x118   :  { %v2312_v3 = vsub.f32 %v2215_v16, %v4053_v24  ;;  %v2314_v20 = vsub.f32 %v2217_v1, %v4053_v24  ;;  %v2017_v55 = vsel %vm1986_vm1, %v1984_v54, %v1308_v26  ;;  %2512 = vmatprep.mubr.bf16.mxu0 %v2665_v30  ;;  %v1948_v56 = vrot.slane %v4191_v31, %v2742_v8 }
 0x119   :  { %v2048_v14 = vsel %vm2019_vm2, %v2015_v33, %v1428_v36  ;;  %v2050_v11 = vsel %vm2019_vm2, %v2017_v55, %v1436_v13  ;;  %v2467_v15 = vrot.slane %v2462_v48, %v2742_v8  ;;  %v2471_v29 = vrot.slane %v2462_v48, %v2744_v9 }
 0x11a   :  { %v2409_v49 = vmul.f32 %v4056_v52, %v2312_v3  ;;  %v2411_v24 = vmul.f32 %v4056_v52, %v2314_v20  ;;  %v2081_v22 = vsel %vm2052_vm3, %v2048_v14, %v1556_v37  ;;  %v2083_v51 = vsel %vm2052_vm3, %v2050_v11, %v1564_v42 }
 0x11b   :  { %v2114_v19 = vsel %vm2085_vm4, %v2081_v22, %v1684_v17  ;;  %v2116_v45 = vsel %vm2085_vm4, %v2083_v51, %v1692_v6 }
 0x11c   :  { %v2427_v41 = vpack.c.bf16 %v2411_v24, %v2409_v49  ;;  %v2147_v5 = vsel %vm2118_vm5, %v2114_v19, %v1812_v28  ;;  %v2149_v31 = vsel %vm2118_vm5, %v2116_v45, %v1820_v44 }
 0x11d   :  { %v2180_v35 = vsel %vm2151_vm6, %v2147_v5, %v1940_v32  ;;  %v2182_v38 = vsel %vm2151_vm6, %v2149_v31, %v1948_v56 }
 0x11e   :  { %2494 = vmatprep.subr.bf16.mxu0 %v2427_v41  ;;  %v2214_v34 = vcvt.s32.f32 %v2180_v35  ;;  %v2216_v52 = vcvt.s32.f32 %v2182_v38 }
 0x120   :  { %v2311_v62 = vsub.f32 %v2214_v34, %v4106_v50  ;;  %v2313_v47 = vsub.f32 %v2216_v52, %v4106_v50 }
 0x122   :  { %v2408_v53 = vmul.f32 %v4109_v25, %v2311_v62  ;;  %v2410_v60 = vmul.f32 %v4109_v25, %v2313_v47 }
 0x124   :  { %v2426_v23 = vpack.c.bf16 %v2410_v60, %v2408_v53 }
 0x126   :  { %2495 = vmatpush1.bf16.msra.mxu0 %v2426_v23 }
 0x129   :  { %2513 = vmatmul.mubr.bf16.vlgmr.msra.gmra.mrb[0].mxu0 %v2562_v58 }
 0x1fc   :  { %v2514_v21 = vpop.f32.mrb[0].mxu0 }
 0x1fd   :  { %v2515_v2 = vadd.f32 %v2514_v21, %v2467_v15  ;;  %v2516_v18 = vpop.f32.mrb[1].mxu0 }
 0x1fe   :  { %v2517_v50 = vadd.f32 %v2516_v18, %v2471_v29  ;;  %v2518_v40 = vpop.f32.mrb[2].mxu0 }
 0x1ff   :  { %2523 = vst [vmem:[#allocation9] sm:$0xff] %v2515_v2  ;;  %v2519_v25 = vadd.f32 %v2518_v40, %v2467_v15  ;;  %v2520_v0 = vpop.f32.mrb[3].mxu0 }
 0x200   :  { %2524 = vst [vmem:[#allocation9 + $0x8] sm:$0xff] %v2517_v50  ;;  %v2521_v10 = vadd.f32 %v2520_v0, %v2471_v29 }
 0x201   :  { %2525 = vst [vmem:[#allocation9 + $0x10] sm:$0xff] %v2519_v25 }
 0x202   :  { %2526 = vst [vmem:[#allocation9 + $0x18] sm:$0xff] %v2521_v10 }
 0x203   :  { %2640 = shalt.err (!%p2637_p0)
}
 0x204   :  { %s2641_s14 = scalar_lea.hbm %s4310_s5, 512 }
 0x205   :  { %p2642_p1 = scmp.ne.s32.totalorder %s4310_s5, %s2641_s14  ;;  %p2645_p2 = scmp.lt.u32.totalorder %s2641_s14, %s4310_s5 }
 0x207   :  { %p2647_p3 = pnand %p2645_p2, %p2642_p1 }
 0x209   :  { %2650 = shalt.err (!%p2647_p3)
}
 0x20a   :  { %2538 = dma.vmem_to_hbm [thread:$0]  %s2533_s11, 512, %s4310_s5, [#allocation5], %s2658_s28, %s2658_s28, %s2659_s29  }
 0x20b   :  { %2655 = dma.done.wait [#allocation5], 512  }
 0x20c   :  { %2656 = vsyncadd [#allocation5], 4294966784 }
 0x20d   :  { %2542 = vsyncpa [#allocation4], 1 }
 0x20e   :  { %2543 = vsyncpa [#allocation7], 1 }
 0x20f   :  { %2544 = vsyncpa [#allocation5], 1 }

</bundles_post_ra>
